<compile_context>
chip_gen: v6e
topology: v6e:2x2x1
jax: 0.10.0
libtpu: 0.0.40
codegen_flags: <defaults>
</compile_context>

<pallas_src>
from functools import partial

import jax
import jax.numpy as jnp
from jax.experimental import pallas as pl
from jax.experimental.pallas import tpu as pltpu

HEADS = 5                     # graph_heads
HIDDEN = 16                   # graph_hidden_dims
SRC_DIMS = 23                 # graph_src_dims = HIDDEN (edge-predictor out) + 7 raw feats
DST_DIMS = 27                 # graph_dst_dims
OUT_DIMS = HIDDEN + HEADS * HIDDEN   # cat([dst_encodings, dst_convs], -1) -> 96
OUT_PAD = 128                 # lane-dense output slab width


def _round_up(x, m):
    return ((x + m - 1) // m) * m


def base_module_kernel(idx_row_ref, idx_col_ref, dst_x_ref, src_x_ref,
                       wdst_ref, bdst_ref, wsrc_ref, bsrc_ref,
                       wl_ref, bl_ref, wr_ref, br_ref,
                       attbd_ref, expand_ref, bconv_ref, out_ref):
    tile = dst_x_ref.shape[0]            # dst rows handled by this grid step
    ns = src_x_ref.shape[0]              # (padded) number of src nodes
    tile_off = pl.program_id(0) * tile   # global dst offset of this tile

    dst_x = dst_x_ref[...]               # (tile, 27)
    src_x = src_x_ref[...]               # (ns, 23)
    idx_row = idx_row_ref[...]           # (1, ns)  int32 dst index per src
    idx_col = idx_col_ref[...]           # (ns, 1)  same, column layout

    # ---- StepThreeModule encoders: Linear + ReLU ----------------------------
    dst_enc = jnp.maximum(
        jnp.dot(dst_x, wdst_ref[...], preferred_element_type=jnp.float32)
        + bdst_ref[...], 0.0)                                        # (tile, 16)
    src_enc = jnp.maximum(
        jnp.dot(src_x, wsrc_ref[...], preferred_element_type=jnp.float32)
        + bsrc_ref[...], 0.0)                                        # (ns, 16)

    # ---- GATv2: fused per-head projections (one 80-wide matmul each) --------
    xl = jnp.dot(src_enc, wl_ref[...],
                 preferred_element_type=jnp.float32) + bl_ref[...]   # (ns, 80)
    xr = jnp.dot(dst_enc, wr_ref[...],
                 preferred_element_type=jnp.float32) + br_ref[...]   # (tile, 80)

    # ---- edge structure rebuilt in-kernel from dst_idx ----------------------
    rows = jax.lax.broadcasted_iota(jnp.int32, (tile, ns), 0) + tile_off
    maskf = (rows == idx_row).astype(jnp.float32)                    # (tile, ns)
    cols = jax.lax.broadcasted_iota(jnp.int32, (ns, tile), 1) + tile_off
    maskTf = (cols == idx_col).astype(jnp.float32)                   # (ns, tile)
    negbias_T = (maskTf - 1.0) * 1e30                                # 0 / -1e30

    # each src has exactly one dst -> gather its dst row via one MXU matmul
    xr_per_src = jnp.dot(maskTf, xr,
                         preferred_element_type=jnp.float32)         # (ns, 80)
    pair = xl + xr_per_src
    pair = jnp.maximum(pair, 0.2 * pair)                             # LeakyReLU(0.2)
    # all-head attention scores with one matmul against block-diag att
    scores = jnp.dot(pair, attbd_ref[...],
                     preferred_element_type=jnp.float32)             # (ns, 5)

    # per-dst (segment) max, gathered back per src -- 2-D bookkeeping only
    m_cols = []
    for h in range(HEADS):                                           # static unroll
        plane = scores[:, h:h + 1] + negbias_T                       # (ns, tile)
        m_dst = jnp.max(plane, axis=0, keepdims=True)                # (1, tile)
        m_src = jnp.sum(maskTf * m_dst, axis=1, keepdims=True)       # (ns, 1)
        m_cols.append(m_src)
    m_all = jnp.concatenate(m_cols, axis=-1)                         # (ns, 5)
    # clamp keeps padded / out-of-tile src finite; exact for real edges
    p = jnp.exp(jnp.minimum(scores - m_all, 0.0))                    # (ns, 5)

    expand = expand_ref[...]                                         # (5, 80)
    denom = jnp.dot(maskf, p, preferred_element_type=jnp.float32)    # (tile, 5)
    p_exp = jnp.dot(p, expand, preferred_element_type=jnp.float32)   # (ns, 80)
    num = jnp.dot(maskf, p_exp * xl,
                  preferred_element_type=jnp.float32)                # (tile, 80)
    inv = 1.0 / (denom + 1e-16)                                      # PyG softmax eps
    inv_exp = jnp.dot(inv, expand, preferred_element_type=jnp.float32)  # (tile, 80)
    conv = jnp.maximum(num * inv_exp + bconv_ref[...], 0.0)          # relu, (tile, 80)

    # lane-dense 128-wide output slab: [dst_enc | conv | zero pad]
    pad = jnp.zeros((tile, out_ref.shape[1] - OUT_DIMS), jnp.float32)
    out_ref[...] = jnp.concatenate([dst_enc, conv, pad], axis=-1)


@partial(jax.jit, static_argnames=("max_tile",))
def base_module_forward(dst_x, src_x, dst_idx, params, max_tile=256):
    nd = dst_x.shape[0]
    ns = src_x.shape[0]

    tile = max_tile if nd >= max_tile else _round_up(nd, 8)
    nd_pad = _round_up(nd, tile)
    ns_pad = _round_up(ns, 128)

    dst_x_p = jnp.pad(dst_x, ((0, nd_pad - nd), (0, 0)))
    src_x_p = jnp.pad(src_x, ((0, ns_pad - ns), (0, 0)))
    idx_p = jnp.pad(dst_idx.astype(jnp.int32), (0, ns_pad - ns),
                    constant_values=-1)                       # -1 == no edge
    idx_row = idx_p.reshape(1, ns_pad)
    idx_col = idx_p.reshape(ns_pad, 1)

    # fuse the 5 per-head GATv2 projections into 80-wide weights
    w_l = jnp.transpose(params['w_l'], (1, 0, 2)).reshape(HIDDEN, HEADS * HIDDEN)
    w_r = jnp.transpose(params['w_r'], (1, 0, 2)).reshape(HIDDEN, HEADS * HIDDEN)
    b_l = params['b_l'].reshape(1, HEADS * HIDDEN)
    b_r = params['b_r'].reshape(1, HEADS * HIDDEN)
    # expand matrix (5,80): head h -> its 16-lane block; att block-diagonal (80,5)
    expand = jnp.kron(jnp.eye(HEADS, dtype=jnp.float32),
                      jnp.ones((1, HIDDEN), jnp.float32))
    att_bd = expand.T * params['att'].reshape(HEADS * HIDDEN, 1)

    args = (idx_row, idx_col, dst_x_p, src_x_p,
            params['w_dst'], params['b_dst'], params['w_src'], params['b_src'],
            w_l, b_l, w_r, b_r, att_bd, expand, params['b_conv'])

    in_specs = [
        pl.BlockSpec(idx_row.shape, lambda i: (0, 0)),
        pl.BlockSpec(idx_col.shape, lambda i: (0, 0)),
        pl.BlockSpec((tile, DST_DIMS), lambda i: (i, 0)),     # tiled over dst
        pl.BlockSpec(src_x_p.shape, lambda i: (0, 0)),
    ] + [pl.BlockSpec(a.shape, lambda i: (0, 0)) for a in args[4:]]

    out = pl.pallas_call(
        base_module_kernel,
        out_shape=jax.ShapeDtypeStruct((nd_pad, OUT_PAD), jnp.float32),
        grid=(nd_pad // tile,),
        in_specs=in_specs,
        out_specs=pl.BlockSpec((tile, OUT_PAD), lambda i: (i, 0)),
        compiler_params=pltpu.CompilerParams(
            dimension_semantics=("parallel",)),
    )(*args)
    return out[:nd, :OUT_DIMS]


def reference_forward(dst_x, src_x, mask, params):
    """Pure-JAX reference with PyTorch/PyG-faithful math (dense mask form)."""
    dst_enc = jnp.maximum(dst_x @ params['w_dst'] + params['b_dst'], 0.0)
    src_enc = jnp.maximum(src_x @ params['w_src'] + params['b_src'], 0.0)
    head_outs = []
    for h in range(HEADS):
        xl = src_enc @ params['w_l'][h] + params['b_l'][h]
        xr = dst_enc @ params['w_r'][h] + params['b_r'][h]
        pair = xl[None, :, :] + xr[:, None, :]
        pair = jnp.where(pair > 0, pair, 0.2 * pair)
        scores = jnp.sum(pair * params['att'][h][None, :, :], axis=-1)
        masked = jnp.where(mask > 0.5, scores, -1e30)
        m = jnp.max(masked, axis=-1, keepdims=True)
        p = jnp.where(mask > 0.5, jnp.exp(scores - m), 0.0)
        alpha = p / (jnp.sum(p, axis=-1, keepdims=True) + 1e-16)
        head_outs.append(alpha @ xl)
    conv = jnp.maximum(jnp.concatenate(head_outs, axis=-1) + params['b_conv'], 0.0)
    return jnp.concatenate([dst_enc, conv], axis=-1)


def _make_graph(key, per_state):
    nd = len(per_state)
    ns = sum(per_state)
    k1, k2 = jax.random.split(key)
    dst_x = jax.random.normal(k1, (nd, DST_DIMS), jnp.float32)
    raw_src = jax.random.normal(k2, (ns, SRC_DIMS - HIDDEN), jnp.float32)
    # edge_mode='noop': zero edge embeddings of width HIDDEN
    src_x = jnp.concatenate([jnp.zeros((ns, HIDDEN), jnp.float32), raw_src], -1)
    dst_idx = jnp.asarray(sum([[i] * n for i, n in enumerate(per_state)], []),
                          jnp.int32)
    mask = (dst_idx[None, :] ==
            jnp.arange(nd, dtype=jnp.int32)[:, None]).astype(jnp.float32)
    return dst_x, src_x, dst_idx, mask


if __name__ == "__main__":
    key = jax.random.PRNGKey(0)
    keys = jax.random.split(key, 14)

    def glorot(k, shape):
        fan_in, fan_out = shape[-2], shape[-1]
        lim = (6.0 / (fan_in + fan_out)) ** 0.5
        return jax.random.uniform(k, shape, jnp.float32, -lim, lim)

    params = {
        'w_dst': glorot(keys[2], (DST_DIMS, HIDDEN)),
        'b_dst': 0.01 * jax.random.normal(keys[3], (1, HIDDEN), jnp.float32),
        'w_src': glorot(keys[4], (SRC_DIMS, HIDDEN)),
        'b_src': 0.01 * jax.random.normal(keys[5], (1, HIDDEN), jnp.float32),
        'w_l': glorot(keys[6], (HEADS, HIDDEN, HIDDEN)),     # GATv2 lin_l (src)
        'b_l': 0.01 * jax.random.normal(keys[7], (HEADS, 1, HIDDEN), jnp.float32),
        'w_r': glorot(keys[8], (HEADS, HIDDEN, HIDDEN)),     # GATv2 lin_r (dst)
        'b_r': 0.01 * jax.random.normal(keys[9], (HEADS, 1, HIDDEN), jnp.float32),
        'att': glorot(keys[10], (HEADS, 1, HIDDEN)),         # GATv2 att vector
        'b_conv': 0.01 * jax.random.normal(keys[11], (1, HEADS * HIDDEN), jnp.float32),
    }

    # --- test 1: tiny batch, 2 states with 3 other vehicles each -------------
    dst_x, src_x, dst_idx, mask = _make_graph(keys[0], [3, 3])
    out = jax.block_until_ready(base_module_forward(dst_x, src_x, dst_idx, params))
    ref = reference_forward(dst_x, src_x, mask, params)
    assert out.shape == (2, OUT_DIMS), out.shape
    assert bool(jnp.allclose(out, ref, atol=1e-4, rtol=1e-4)), \
        "Pallas kernel mismatch vs pure-JAX reference (test 1)"

    # --- test 2: multi-tile grid (24 dst states, tile=8 -> 3 grid steps), ----
    # ragged group sizes incl. empty groups, Ns not a multiple of 8/128.
    per_state2 = [(i * 7) % 5 for i in range(24)]
    dst_x2, src_x2, dst_idx2, mask2 = _make_graph(keys[1], per_state2)
    out2 = jax.block_until_ready(
        base_module_forward(dst_x2, src_x2, dst_idx2, params, max_tile=8))
    ref2 = reference_forward(dst_x2, src_x2, mask2, params)
    assert out2.shape == (24, OUT_DIMS), out2.shape
    assert bool(jnp.allclose(out2, ref2, atol=1e-4, rtol=1e-4)), \
        "Pallas kernel mismatch vs pure-JAX reference (test 2)"

    print("KERNEL_OK")
</pallas_src>

<mosaic_0001>
module attributes {stable_mosaic.version = 11 : i64} {
  func.func @base_module_kernel(%arg0: i32, %arg1: memref<1x128xi32, #tpu.memory_space<vmem>>, %arg2: memref<128x1xi32, #tpu.memory_space<vmem>>, %arg3: memref<8x27xf32, #tpu.memory_space<vmem>>, %arg4: memref<128x23xf32, #tpu.memory_space<vmem>>, %arg5: memref<27x16xf32, #tpu.memory_space<vmem>>, %arg6: memref<1x16xf32, #tpu.memory_space<vmem>>, %arg7: memref<23x16xf32, #tpu.memory_space<vmem>>, %arg8: memref<1x16xf32, #tpu.memory_space<vmem>>, %arg9: memref<16x80xf32, #tpu.memory_space<vmem>>, %arg10: memref<1x80xf32, #tpu.memory_space<vmem>>, %arg11: memref<16x80xf32, #tpu.memory_space<vmem>>, %arg12: memref<1x80xf32, #tpu.memory_space<vmem>>, %arg13: memref<80x5xf32, #tpu.memory_space<vmem>>, %arg14: memref<5x80xf32, #tpu.memory_space<vmem>>, %arg15: memref<1x80xf32, #tpu.memory_space<vmem>>, %arg16: memref<8x128xf32, #tpu.memory_space<vmem>>) attributes {dimension_semantics = [#tpu.dimension_semantics<parallel>], iteration_bounds = array<i64: 1>, scalar_prefetch = 0 : i64, scratch_operands = 0 : i64, tpu.core_type = #tpu.core_type<tc>, window_params = [{pipeline_mode = #tpu.pipeline_mode<synchronous>, transform_indices = @transform_0, window_bounds = array<i64: 1, 128>}, {pipeline_mode = #tpu.pipeline_mode<synchronous>, transform_indices = @transform_1, window_bounds = array<i64: 128, 1>}, {transform_indices = @transform_2, window_bounds = array<i64: 8, 27>}, {pipeline_mode = #tpu.pipeline_mode<synchronous>, transform_indices = @transform_3, window_bounds = array<i64: 128, 23>}, {pipeline_mode = #tpu.pipeline_mode<synchronous>, transform_indices = @transform_4, window_bounds = array<i64: 27, 16>}, {pipeline_mode = #tpu.pipeline_mode<synchronous>, transform_indices = @transform_5, window_bounds = array<i64: 1, 16>}, {pipeline_mode = #tpu.pipeline_mode<synchronous>, transform_indices = @transform_6, window_bounds = array<i64: 23, 16>}, {pipeline_mode = #tpu.pipeline_mode<synchronous>, transform_indices = @transform_7, window_bounds = array<i64: 1, 16>}, {pipeline_mode = #tpu.pipeline_mode<synchronous>, transform_indices = @transform_8, window_bounds = array<i64: 16, 80>}, {pipeline_mode = #tpu.pipeline_mode<synchronous>, transform_indices = @transform_9, window_bounds = array<i64: 1, 80>}, {pipeline_mode = #tpu.pipeline_mode<synchronous>, transform_indices = @transform_10, window_bounds = array<i64: 16, 80>}, {pipeline_mode = #tpu.pipeline_mode<synchronous>, transform_indices = @transform_11, window_bounds = array<i64: 1, 80>}, {pipeline_mode = #tpu.pipeline_mode<synchronous>, transform_indices = @transform_12, window_bounds = array<i64: 80, 5>}, {pipeline_mode = #tpu.pipeline_mode<synchronous>, transform_indices = @transform_13, window_bounds = array<i64: 5, 80>}, {pipeline_mode = #tpu.pipeline_mode<synchronous>, transform_indices = @transform_14, window_bounds = array<i64: 1, 80>}, {transform_indices = @transform_15, window_bounds = array<i64: 8, 128>}]} {
    %c8_i32 = arith.constant 8 : i32
    %0 = arith.muli %arg0, %c8_i32 : i32
    %c0 = arith.constant 0 : index
    %c0_0 = arith.constant 0 : index
    %1 = vector.load %arg3[%c0, %c0_0] : memref<8x27xf32, #tpu.memory_space<vmem>>, vector<8x27xf32>
    %c0_1 = arith.constant 0 : index
    %c0_2 = arith.constant 0 : index
    %2 = vector.load %arg4[%c0_1, %c0_2] : memref<128x23xf32, #tpu.memory_space<vmem>>, vector<128x23xf32>
    %c0_3 = arith.constant 0 : index
    %c0_4 = arith.constant 0 : index
    %3 = vector.load %arg1[%c0_3, %c0_4] : memref<1x128xi32, #tpu.memory_space<vmem>>, vector<1x128xi32>
    %c0_5 = arith.constant 0 : index
    %c0_6 = arith.constant 0 : index
    %4 = vector.load %arg2[%c0_5, %c0_6] : memref<128x1xi32, #tpu.memory_space<vmem>>, vector<128x1xi32>
    %c0_7 = arith.constant 0 : index
    %c0_8 = arith.constant 0 : index
    %5 = vector.load %arg5[%c0_7, %c0_8] : memref<27x16xf32, #tpu.memory_space<vmem>>, vector<27x16xf32>
    %cst = arith.constant dense<0.000000e+00> : vector<8x16xf32>
    %6 = tpu.matmul %1, %5, %cst {dimension_numbers = #tpu.dot_dimension_numbers<[1], [0], [0], [1], [0, 0, 1, 1], [], []>} : vector<8x27xf32>, vector<27x16xf32>, vector<8x16xf32> -> vector<8x16xf32>
    %c0_9 = arith.constant 0 : index
    %c0_10 = arith.constant 0 : index
    %7 = vector.load %arg6[%c0_9, %c0_10] : memref<1x16xf32, #tpu.memory_space<vmem>>, vector<1x16xf32>
    %8 = vector.broadcast %7 : vector<1x16xf32> to vector<8x16xf32>
    %9 = arith.addf %6, %8 : vector<8x16xf32>
    %cst_11 = arith.constant 0.000000e+00 : f32
    %10 = vector.broadcast %cst_11 : f32 to vector<8x16xf32>
    %11 = arith.maximumf %9, %10 : vector<8x16xf32>
    %c0_12 = arith.constant 0 : index
    %c0_13 = arith.constant 0 : index
    %12 = vector.load %arg7[%c0_12, %c0_13] : memref<23x16xf32, #tpu.memory_space<vmem>>, vector<23x16xf32>
    %cst_14 = arith.constant dense<0.000000e+00> : vector<128x16xf32>
    %13 = tpu.matmul %2, %12, %cst_14 {dimension_numbers = #tpu.dot_dimension_numbers<[1], [0], [0], [1], [0, 0, 1, 1], [], []>} : vector<128x23xf32>, vector<23x16xf32>, vector<128x16xf32> -> vector<128x16xf32>
    %c0_15 = arith.constant 0 : index
    %c0_16 = arith.constant 0 : index
    %14 = vector.load %arg8[%c0_15, %c0_16] : memref<1x16xf32, #tpu.memory_space<vmem>>, vector<1x16xf32>
    %15 = vector.broadcast %14 : vector<1x16xf32> to vector<128x16xf32>
    %16 = arith.addf %13, %15 : vector<128x16xf32>
    %cst_17 = arith.constant 0.000000e+00 : f32
    %17 = vector.broadcast %cst_17 : f32 to vector<128x16xf32>
    %18 = arith.maximumf %16, %17 : vector<128x16xf32>
    %c0_18 = arith.constant 0 : index
    %c0_19 = arith.constant 0 : index
    %19 = vector.load %arg9[%c0_18, %c0_19] : memref<16x80xf32, #tpu.memory_space<vmem>>, vector<16x80xf32>
    %cst_20 = arith.constant dense<0.000000e+00> : vector<128x80xf32>
    %20 = tpu.matmul %18, %19, %cst_20 {dimension_numbers = #tpu.dot_dimension_numbers<[1], [0], [0], [1], [0, 0, 1, 1], [], []>} : vector<128x16xf32>, vector<16x80xf32>, vector<128x80xf32> -> vector<128x80xf32>
    %c0_21 = arith.constant 0 : index
    %c0_22 = arith.constant 0 : index
    %21 = vector.load %arg10[%c0_21, %c0_22] : memref<1x80xf32, #tpu.memory_space<vmem>>, vector<1x80xf32>
    %22 = vector.broadcast %21 : vector<1x80xf32> to vector<128x80xf32>
    %23 = arith.addf %20, %22 : vector<128x80xf32>
    %c0_23 = arith.constant 0 : index
    %c0_24 = arith.constant 0 : index
    %24 = vector.load %arg11[%c0_23, %c0_24] : memref<16x80xf32, #tpu.memory_space<vmem>>, vector<16x80xf32>
    %cst_25 = arith.constant dense<0.000000e+00> : vector<8x80xf32>
    %25 = tpu.matmul %11, %24, %cst_25 {dimension_numbers = #tpu.dot_dimension_numbers<[1], [0], [0], [1], [0, 0, 1, 1], [], []>} : vector<8x16xf32>, vector<16x80xf32>, vector<8x80xf32> -> vector<8x80xf32>
    %c0_26 = arith.constant 0 : index
    %c0_27 = arith.constant 0 : index
    %26 = vector.load %arg12[%c0_26, %c0_27] : memref<1x80xf32, #tpu.memory_space<vmem>>, vector<1x80xf32>
    %27 = vector.broadcast %26 : vector<1x80xf32> to vector<8x80xf32>
    %28 = arith.addf %25, %27 : vector<8x80xf32>
    %29 = tpu.iota {dimensions = array<i32: 0>} : vector<8x128xi32>
    %30 = vector.broadcast %0 : i32 to vector<8x128xi32>
    %31 = arith.addi %29, %30 : vector<8x128xi32>
    %32 = vector.broadcast %3 : vector<1x128xi32> to vector<8x128xi32>
    %33 = arith.cmpi eq, %31, %32 : vector<8x128xi32>
    %34 = arith.extui %33 : vector<8x128xi1> to vector<8x128xi32>
    %35 = arith.sitofp %34 : vector<8x128xi32> to vector<8x128xf32>
    %36 = tpu.iota {dimensions = array<i32: 1>} : vector<128x8xi32>
    %37 = vector.broadcast %0 : i32 to vector<128x8xi32>
    %38 = arith.addi %36, %37 : vector<128x8xi32>
    %39 = vector.broadcast %4 : vector<128x1xi32> to vector<128x8xi32>
    %40 = arith.cmpi eq, %38, %39 : vector<128x8xi32>
    %41 = arith.extui %40 : vector<128x8xi1> to vector<128x8xi32>
    %42 = arith.sitofp %41 : vector<128x8xi32> to vector<128x8xf32>
    %cst_28 = arith.constant 1.000000e+00 : f32
    %43 = vector.broadcast %cst_28 : f32 to vector<128x8xf32>
    %44 = arith.subf %42, %43 : vector<128x8xf32>
    %cst_29 = arith.constant 1.000000e+30 : f32
    %45 = vector.broadcast %cst_29 : f32 to vector<128x8xf32>
    %46 = arith.mulf %44, %45 : vector<128x8xf32>
    %cst_30 = arith.constant dense<0.000000e+00> : vector<128x80xf32>
    %47 = tpu.matmul %42, %28, %cst_30 {dimension_numbers = #tpu.dot_dimension_numbers<[1], [0], [0], [1], [0, 0, 1, 1], [], []>} : vector<128x8xf32>, vector<8x80xf32>, vector<128x80xf32> -> vector<128x80xf32>
    %48 = arith.addf %23, %47 : vector<128x80xf32>
    %cst_31 = arith.constant 2.000000e-01 : f32
    %49 = vector.broadcast %cst_31 : f32 to vector<128x80xf32>
    %50 = arith.mulf %49, %48 : vector<128x80xf32>
    %51 = arith.maximumf %48, %50 : vector<128x80xf32>
    %c0_32 = arith.constant 0 : index
    %c0_33 = arith.constant 0 : index
    %52 = vector.load %arg13[%c0_32, %c0_33] : memref<80x5xf32, #tpu.memory_space<vmem>>, vector<80x5xf32>
    %cst_34 = arith.constant dense<0.000000e+00> : vector<128x5xf32>
    %53 = tpu.matmul %51, %52, %cst_34 {dimension_numbers = #tpu.dot_dimension_numbers<[1], [0], [0], [1], [0, 0, 1, 1], [], []>} : vector<128x80xf32>, vector<80x5xf32>, vector<128x5xf32> -> vector<128x5xf32>
    %54 = vector.extract_strided_slice %53 {offsets = [0, 0], sizes = [128, 1], strides = [1, 1]} : vector<128x5xf32> to vector<128x1xf32>
    %55 = vector.broadcast %54 : vector<128x1xf32> to vector<128x8xf32>
    %56 = arith.addf %55, %46 : vector<128x8xf32>
    %cst_35 = arith.constant dense<0xFF800000> : vector<8xf32>
    %57 = vector.multi_reduction <maximumf>, %56, %cst_35 [0] : vector<128x8xf32> to vector<8xf32>
    %58 = vector.shape_cast %57 : vector<8xf32> to vector<1x8xf32>
    %59 = vector.broadcast %58 : vector<1x8xf32> to vector<128x8xf32>
    %60 = arith.mulf %42, %59 : vector<128x8xf32>
    %cst_36 = arith.constant dense<0.000000e+00> : vector<128xf32>
    %61 = vector.multi_reduction <add>, %60, %cst_36 [1] : vector<128x8xf32> to vector<128xf32>
    %62 = vector.shape_cast %61 : vector<128xf32> to vector<128x1xf32>
    %63 = vector.extract_strided_slice %53 {offsets = [0, 1], sizes = [128, 1], strides = [1, 1]} : vector<128x5xf32> to vector<128x1xf32>
    %64 = vector.broadcast %63 : vector<128x1xf32> to vector<128x8xf32>
    %65 = arith.addf %64, %46 : vector<128x8xf32>
    %cst_37 = arith.constant dense<0xFF800000> : vector<8xf32>
    %66 = vector.multi_reduction <maximumf>, %65, %cst_37 [0] : vector<128x8xf32> to vector<8xf32>
    %67 = vector.shape_cast %66 : vector<8xf32> to vector<1x8xf32>
    %68 = vector.broadcast %67 : vector<1x8xf32> to vector<128x8xf32>
    %69 = arith.mulf %42, %68 : vector<128x8xf32>
    %cst_38 = arith.constant dense<0.000000e+00> : vector<128xf32>
    %70 = vector.multi_reduction <add>, %69, %cst_38 [1] : vector<128x8xf32> to vector<128xf32>
    %71 = vector.shape_cast %70 : vector<128xf32> to vector<128x1xf32>
    %72 = vector.extract_strided_slice %53 {offsets = [0, 2], sizes = [128, 1], strides = [1, 1]} : vector<128x5xf32> to vector<128x1xf32>
    %73 = vector.broadcast %72 : vector<128x1xf32> to vector<128x8xf32>
    %74 = arith.addf %73, %46 : vector<128x8xf32>
    %cst_39 = arith.constant dense<0xFF800000> : vector<8xf32>
    %75 = vector.multi_reduction <maximumf>, %74, %cst_39 [0] : vector<128x8xf32> to vector<8xf32>
    %76 = vector.shape_cast %75 : vector<8xf32> to vector<1x8xf32>
    %77 = vector.broadcast %76 : vector<1x8xf32> to vector<128x8xf32>
    %78 = arith.mulf %42, %77 : vector<128x8xf32>
    %cst_40 = arith.constant dense<0.000000e+00> : vector<128xf32>
    %79 = vector.multi_reduction <add>, %78, %cst_40 [1] : vector<128x8xf32> to vector<128xf32>
    %80 = vector.shape_cast %79 : vector<128xf32> to vector<128x1xf32>
    %81 = vector.extract_strided_slice %53 {offsets = [0, 3], sizes = [128, 1], strides = [1, 1]} : vector<128x5xf32> to vector<128x1xf32>
    %82 = vector.broadcast %81 : vector<128x1xf32> to vector<128x8xf32>
    %83 = arith.addf %82, %46 : vector<128x8xf32>
    %cst_41 = arith.constant dense<0xFF800000> : vector<8xf32>
    %84 = vector.multi_reduction <maximumf>, %83, %cst_41 [0] : vector<128x8xf32> to vector<8xf32>
    %85 = vector.shape_cast %84 : vector<8xf32> to vector<1x8xf32>
    %86 = vector.broadcast %85 : vector<1x8xf32> to vector<128x8xf32>
    %87 = arith.mulf %42, %86 : vector<128x8xf32>
    %cst_42 = arith.constant dense<0.000000e+00> : vector<128xf32>
    %88 = vector.multi_reduction <add>, %87, %cst_42 [1] : vector<128x8xf32> to vector<128xf32>
    %89 = vector.shape_cast %88 : vector<128xf32> to vector<128x1xf32>
    %90 = vector.extract_strided_slice %53 {offsets = [0, 4], sizes = [128, 1], strides = [1, 1]} : vector<128x5xf32> to vector<128x1xf32>
    %91 = vector.broadcast %90 : vector<128x1xf32> to vector<128x8xf32>
    %92 = arith.addf %91, %46 : vector<128x8xf32>
    %cst_43 = arith.constant dense<0xFF800000> : vector<8xf32>
    %93 = vector.multi_reduction <maximumf>, %92, %cst_43 [0] : vector<128x8xf32> to vector<8xf32>
    %94 = vector.shape_cast %93 : vector<8xf32> to vector<1x8xf32>
    %95 = vector.broadcast %94 : vector<1x8xf32> to vector<128x8xf32>
    %96 = arith.mulf %42, %95 : vector<128x8xf32>
    %cst_44 = arith.constant dense<0.000000e+00> : vector<128xf32>
    %97 = vector.multi_reduction <add>, %96, %cst_44 [1] : vector<128x8xf32> to vector<128xf32>
    %98 = vector.shape_cast %97 : vector<128xf32> to vector<128x1xf32>
    %99 = tpu.concatenate %62, %71, %80, %89, %98 in 1 : vector<128x1xf32>, vector<128x1xf32>, vector<128x1xf32>, vector<128x1xf32>, vector<128x1xf32> -> vector<128x5xf32>
    %100 = arith.subf %53, %99 : vector<128x5xf32>
    %cst_45 = arith.constant 0.000000e+00 : f32
    %101 = vector.broadcast %cst_45 : f32 to vector<128x5xf32>
    %102 = arith.minimumf %100, %101 : vector<128x5xf32>
    %103 = math.exp %102 : vector<128x5xf32>
    %c0_46 = arith.constant 0 : index
    %c0_47 = arith.constant 0 : index
    %104 = vector.load %arg14[%c0_46, %c0_47] : memref<5x80xf32, #tpu.memory_space<vmem>>, vector<5x80xf32>
    %cst_48 = arith.constant dense<0.000000e+00> : vector<8x5xf32>
    %105 = tpu.matmul %35, %103, %cst_48 {dimension_numbers = #tpu.dot_dimension_numbers<[1], [0], [0], [1], [0, 0, 1, 1], [], []>} : vector<8x128xf32>, vector<128x5xf32>, vector<8x5xf32> -> vector<8x5xf32>
    %cst_49 = arith.constant dense<0.000000e+00> : vector<128x80xf32>
    %106 = tpu.matmul %103, %104, %cst_49 {dimension_numbers = #tpu.dot_dimension_numbers<[1], [0], [0], [1], [0, 0, 1, 1], [], []>} : vector<128x5xf32>, vector<5x80xf32>, vector<128x80xf32> -> vector<128x80xf32>
    %107 = arith.mulf %106, %23 : vector<128x80xf32>
    %cst_50 = arith.constant dense<0.000000e+00> : vector<8x80xf32>
    %108 = tpu.matmul %35, %107, %cst_50 {dimension_numbers = #tpu.dot_dimension_numbers<[1], [0], [0], [1], [0, 0, 1, 1], [], []>} : vector<8x128xf32>, vector<128x80xf32>, vector<8x80xf32> -> vector<8x80xf32>
    %cst_51 = arith.constant 1.000000e-16 : f32
    %109 = vector.broadcast %cst_51 : f32 to vector<8x5xf32>
    %110 = arith.addf %105, %109 : vector<8x5xf32>
    %cst_52 = arith.constant 1.000000e+00 : f32
    %111 = vector.broadcast %cst_52 : f32 to vector<8x5xf32>
    %112 = arith.divf %111, %110 : vector<8x5xf32>
    %cst_53 = arith.constant dense<0.000000e+00> : vector<8x80xf32>
    %113 = tpu.matmul %112, %104, %cst_53 {dimension_numbers = #tpu.dot_dimension_numbers<[1], [0], [0], [1], [0, 0, 1, 1], [], []>} : vector<8x5xf32>, vector<5x80xf32>, vector<8x80xf32> -> vector<8x80xf32>
    %114 = arith.mulf %108, %113 : vector<8x80xf32>
    %c0_54 = arith.constant 0 : index
    %c0_55 = arith.constant 0 : index
    %115 = vector.load %arg15[%c0_54, %c0_55] : memref<1x80xf32, #tpu.memory_space<vmem>>, vector<1x80xf32>
    %116 = vector.broadcast %115 : vector<1x80xf32> to vector<8x80xf32>
    %117 = arith.addf %114, %116 : vector<8x80xf32>
    %cst_56 = arith.constant 0.000000e+00 : f32
    %118 = vector.broadcast %cst_56 : f32 to vector<8x80xf32>
    %119 = arith.maximumf %117, %118 : vector<8x80xf32>
    %cst_57 = arith.constant 0.000000e+00 : f32
    %120 = vector.broadcast %cst_57 : f32 to vector<8x32xf32>
    %121 = tpu.concatenate %11, %119, %120 in 1 : vector<8x16xf32>, vector<8x80xf32>, vector<8x32xf32> -> vector<8x128xf32>
    %c0_58 = arith.constant 0 : index
    %c0_59 = arith.constant 0 : index
    %122 = vector.load %arg16[%c0_58, %c0_59] : memref<8x128xf32, #tpu.memory_space<vmem>>, vector<8x128xf32>
    tpu.vector_store %arg16[%c0_58, %c0_59], %121 {strides = array<i32>} : memref<8x128xf32, #tpu.memory_space<vmem>>, vector<8x128xf32>,
    return
  }
  func.func @transform_0(%arg0: i32) -> (i32, i32) {
    %c0_i32 = arith.constant 0 : i32
    %c0_i32_0 = arith.constant 0 : i32
    %c0_i32_1 = arith.constant 0 : i32
    return %c0_i32, %c0_i32_0 : i32, i32
  }
  func.func @transform_1(%arg0: i32) -> (i32, i32) {
    %c0_i32 = arith.constant 0 : i32
    %c0_i32_0 = arith.constant 0 : i32
    %c0_i32_1 = arith.constant 0 : i32
    return %c0_i32, %c0_i32_0 : i32, i32
  }
  func.func @transform_2(%arg0: i32) -> (i32, i32) {
    %c0_i32 = arith.constant 0 : i32
    %c0_i32_0 = arith.constant 0 : i32
    return %arg0, %c0_i32 : i32, i32
  }
  func.func @transform_3(%arg0: i32) -> (i32, i32) {
    %c0_i32 = arith.constant 0 : i32
    %c0_i32_0 = arith.constant 0 : i32
    %c0_i32_1 = arith.constant 0 : i32
    return %c0_i32, %c0_i32_0 : i32, i32
  }
  func.func @transform_4(%arg0: i32) -> (i32, i32) {
    %c0_i32 = arith.constant 0 : i32
    %c0_i32_0 = arith.constant 0 : i32
    %c0_i32_1 = arith.constant 0 : i32
    return %c0_i32, %c0_i32_0 : i32, i32
  }
  func.func @transform_5(%arg0: i32) -> (i32, i32) {
    %c0_i32 = arith.constant 0 : i32
    %c0_i32_0 = arith.constant 0 : i32
    %c0_i32_1 = arith.constant 0 : i32
    return %c0_i32, %c0_i32_0 : i32, i32
  }
  func.func @transform_6(%arg0: i32) -> (i32, i32) {
    %c0_i32 = arith.constant 0 : i32
    %c0_i32_0 = arith.constant 0 : i32
    %c0_i32_1 = arith.constant 0 : i32
    return %c0_i32, %c0_i32_0 : i32, i32
  }
  func.func @transform_7(%arg0: i32) -> (i32, i32) {
    %c0_i32 = arith.constant 0 : i32
    %c0_i32_0 = arith.constant 0 : i32
    %c0_i32_1 = arith.constant 0 : i32
    return %c0_i32, %c0_i32_0 : i32, i32
  }
  func.func @transform_8(%arg0: i32) -> (i32, i32) {
    %c0_i32 = arith.constant 0 : i32
    %c0_i32_0 = arith.constant 0 : i32
    %c0_i32_1 = arith.constant 0 : i32
    return %c0_i32, %c0_i32_0 : i32, i32
  }
  func.func @transform_9(%arg0: i32) -> (i32, i32) {
    %c0_i32 = arith.constant 0 : i32
    %c0_i32_0 = arith.constant 0 : i32
    %c0_i32_1 = arith.constant 0 : i32
    return %c0_i32, %c0_i32_0 : i32, i32
  }
  func.func @transform_10(%arg0: i32) -> (i32, i32) {
    %c0_i32 = arith.constant 0 : i32
    %c0_i32_0 = arith.constant 0 : i32
    %c0_i32_1 = arith.constant 0 : i32
    return %c0_i32, %c0_i32_0 : i32, i32
  }
  func.func @transform_11(%arg0: i32) -> (i32, i32) {
    %c0_i32 = arith.constant 0 : i32
    %c0_i32_0 = arith.constant 0 : i32
    %c0_i32_1 = arith.constant 0 : i32
    return %c0_i32, %c0_i32_0 : i32, i32
  }
  func.func @transform_12(%arg0: i32) -> (i32, i32) {
    %c0_i32 = arith.constant 0 : i32
    %c0_i32_0 = arith.constant 0 : i32
    %c0_i32_1 = arith.constant 0 : i32
    return %c0_i32, %c0_i32_0 : i32, i32
  }
  func.func @transform_13(%arg0: i32) -> (i32, i32) {
    %c0_i32 = arith.constant 0 : i32
    %c0_i32_0 = arith.constant 0 : i32
    %c0_i32_1 = arith.constant 0 : i32
    return %c0_i32, %c0_i32_0 : i32, i32
  }
  func.func @transform_14(%arg0: i32) -> (i32, i32) {
    %c0_i32 = arith.constant 0 : i32
    %c0_i32_0 = arith.constant 0 : i32
    %c0_i32_1 = arith.constant 0 : i32
    return %c0_i32, %c0_i32_0 : i32, i32
  }
  func.func @transform_15(%arg0: i32) -> (i32, i32) {
    %c0_i32 = arith.constant 0 : i32
    %c0_i32_0 = arith.constant 0 : i32
    return %arg0, %c0_i32 : i32, i32
  }
}

</mosaic_0001>

<bundles_post_ra>
// kernel: mul.19
= control target key start
LH: loop header
LB: loop body
LE: loop exit
PB: predicated region body
PF: predicated region fallthrough
CT: control target
= control target key end

     0   :  { %s45_s10 = smov 64   ;;  %s46_s11 = smov 32   ;;  %vm3_vm0 = vcmask 130048   ;;  %vm9_vm1 = vcmask 654848   ;;  %vm15_vm2 = vcmask 523648   ;;  %vm21_vm3 = vcmask 392448   ;;  %s77_s0 = inlined_call_operand.vmem [shape: f32[5,16], index: 0, kind: input, shape index: {}]   ;;  %s78_s1 = inlined_call_operand.vmem [shape: f32[80], index: 1, kind: output, shape index: {}]  }
   0x1   :  { %v37_v0 = vld [vmem:[%s77_s0 + $0x4] sm:$0x1]   ;;  %v39_v1 = vld [vmem:[%s77_s0 + $0x2] sm:$0x1]   ;;  %v38_v2 = vld [vmem:[%s77_s0 + $0x3] sm:$0x1]  }
   0x2   :  { %7 = vrot.lane.b32.xlu0 %v37_v0, %s45_s10  ;;  %19 = vrot.lane.b32.xlu1 %v39_v1, %s46_s11  ;;  %v40_v3 = vld [vmem:[%s77_s0 + $0x1] sm:$0x1]   ;;  %v2_v4 = vld [vmem:[%s77_s0] sm:$0x1]   ;;  %s47_s0 = smov 48   ;;  %s48_s18 = smov 16  }
   0x3   :  { %4 = vst.msk [vmem:[#allocation0] sm:$0x1] %vm3_vm0, %v2_v4   ;;  %vm27_vm4 = vcmask 261248  }
   0x6   :  { %13 = vrot.lane.b32.xlu0 %v38_v2, %s47_s0  ;;  %25 = vrot.lane.b32.xlu1 %v40_v3, %s48_s18 }
  0x74   :  { %v8_v5 = vpop.permute.xlu0 %7   ;;  %v20_v6 = vpop.permute.xlu1 %19  }
  0x75   :  { %10 = vst.msk [vmem:[#allocation0] sm:$0x1] %vm9_vm1, %v8_v5  }
  0x78   :  { %v14_v7 = vpop.permute.xlu0 %13   ;;  %v26_v8 = vpop.permute.xlu1 %25  }
  0x79   :  { %16 = vst.msk [vmem:[#allocation0] sm:$0x1] %vm15_vm2, %v14_v7  }
  0x7a   :  { %22 = vst.msk [vmem:[#allocation0] sm:$0x1] %vm21_vm3, %v20_v6  }
  0x7b   :  { %28 = vst.msk [vmem:[#allocation0] sm:$0x1] %vm27_vm4, %v26_v8  }
  0x82   :  { %v33_v9 = vld [vmem:[#allocation0] sm:$0x1] }
  0x83   :  { %36 = vst [vmem:[%s78_s1] sm:$0x1] %v33_v9 }

// kernel: base_module_forward.1
= control target key start
LH: loop header
LB: loop body
LE: loop exit
PB: predicated region body
PF: predicated region fallthrough
CT: control target
= control target key end

     0   :  { %vm100_vm0 = vcmask 1042432   ;;  %v4994_v0 = vmov 0.0   ;;  %vm3423_vm1 = vmmov 0   ;;  %vm234_vm2 = vcmask 1046528   ;;  %s4976_s4 = inlined_call_operand.vmem [shape: f32[27,16], index: 4, kind: input, shape index: {}]   ;;  %s4977_s6 = inlined_call_operand.vmem [shape: f32[23,16], index: 6, kind: input, shape index: {}]   ;;  %s4978_s2 = inlined_call_operand.vmem [shape: f32[8,27], index: 2, kind: input, shape index: {}]   ;;  %s4979_s3 = inlined_call_operand.vmem [shape: f32[128,23], index: 3, kind: input, shape index: {}]   ;;  %s4980_s10 = inlined_call_operand.vmem [shape: f32[16,80], index: 10, kind: input, shape index: {}]   ;;  %s4981_s1 = inlined_call_operand.vmem [shape: s32[128,1], index: 1, kind: input, shape index: {}]   ;;  %s4982_s8 = inlined_call_operand.vmem [shape: f32[16,80], index: 8, kind: input, shape index: {}]   ;;  %s4983_s5 = inlined_call_operand.vmem [shape: f32[1,16], index: 5, kind: input, shape index: {}]   ;;  %s4984_s7 = inlined_call_operand.vmem [shape: f32[1,16], index: 7, kind: input, shape index: {}]   ;;  %s4985_s12 = inlined_call_operand.vmem [shape: f32[80,5], index: 12, kind: input, shape index: {}]   ;;  %s4986_s11 = inlined_call_operand.vmem [shape: f32[1,80], index: 11, kind: input, shape index: {}]   ;;  %s4987_s9 = inlined_call_operand.vmem [shape: f32[1,80], index: 9, kind: input, shape index: {}]   ;;  %s4988_s13 = inlined_call_operand.vmem [shape: f32[5,80], index: 13, kind: input, shape index: {}]   ;;  %s4989_s0 = inlined_call_operand.vmem [shape: s32[1,128], index: 0, kind: input, shape index: {}]   ;;  %s4990_s14 = inlined_call_operand.vmem [shape: f32[1,80], index: 14, kind: input, shape index: {}]   ;;  %s4991_s15 = inlined_call_operand.vmem [shape: f32[8,128], index: 15, kind: output, shape index: {}]  }
   0x1   :  { %3046 = vmatprep.subr.mxu0 %v4994_v0  ;;  %v88_v1 = vld [vmem:[%s4976_s4 + $0x18] sm:$0x7]  ;;  %v87_v2 = vld [vmem:[%s4976_s4 + $0x10] sm:$0xff]  ;;  %3054 = vmatprep.mubr.msk.f32.mxu0 %vm3423_vm1, %v4994_v0  ;;  %v86_v4 = vld [vmem:[%s4976_s4 + $0x8] sm:$0xff]  ;;  %vm96_vm3 = vcmask 220160   ;;  %vm185_vm4 = vcmask 187392  }
   0x2   :  { %3047 = vmatpush3.msk.msra.mxu0 %vm100_vm0, %v88_v1  ;;  %v177_v3 = vld [vmem:[%s4977_s6 + $0x10] sm:$0x7f]  ;;  %v176_v5 = vld [vmem:[%s4977_s6 + $0x8] sm:$0xff]  ;;  %v85_v6 = vld [vmem:[%s4976_s4] sm:$0xff]  ;;  %v4996_v27 = vmov 0   ;;  %vm408_vm5 = vcmask 130048  }
   0x3   :  { %3048 = vmatprep.subr.mxu0 %v4994_v0  ;;  %3293 = vmatprep.subr.msk.mxu1 %vm234_vm2, %v177_v3  ;;  %v51_v7 = vld [vmem:[%s4978_s2] sm:$0xff]  ;;  %v58_v10 = vld [vmem:[%s4979_s3 + $0x30] sm:$0xff]  ;;  %v59_v11 = vld [vmem:[%s4979_s3 + $0x38] sm:$0xff]  ;;  %vm826_vm7 = vcmask 64512  }
   0x4   :  { %3049 = vmatpush3.msra.mxu0 %v87_v2  ;;  %3296 = vmatpush3.msk.msra.mxu1 %vm234_vm2, %v177_v3  ;;  %v175_v8 = vld [vmem:[%s4977_s6] sm:$0xff]  ;;  %v53_v13 = vld [vmem:[%s4979_s3 + $0x8] sm:$0xff]  ;;  %v54_v15 = vld [vmem:[%s4979_s3 + $0x10] sm:$0xff] }
   0x5   :  { %3050 = vmatprep.subr.mxu0 %v4994_v0  ;;  %3294 = vmatprep.subr.mxu1 %v176_v5  ;;  %v52_v9 = vld [vmem:[%s4979_s3] sm:$0xff]  ;;  %v603_v14 = vld [vmem:[%s4980_s10 + $0x8] sm:$0xff]  ;;  %v62_v17 = vld [vmem:[%s4979_s3 + $0x50] sm:$0xff] }
   0x6   :  { %3051 = vmatpush3.msra.mxu0 %v86_v4  ;;  %3297 = vmatpush3.msra.mxu1 %v176_v5  ;;  %v60_v12 = vld [vmem:[%s4979_s3 + $0x40] sm:$0xff]  ;;  %v61_v16 = vld [vmem:[%s4979_s3 + $0x48] sm:$0xff]  ;;  %v55_v19 = vld [vmem:[%s4979_s3 + $0x18] sm:$0xff] }
   0x7   :  { %3052 = vmatprep.subr.mxu0 %v4994_v0  ;;  %3295 = vmatprep.subr.mxu1 %v175_v8  ;;  %v602_v18 = vld [vmem:[%s4980_s10] sm:$0xff]  ;;  %v63_v21 = vld [vmem:[%s4979_s3 + $0x58] sm:$0xff]  ;;  %v57_v23 = vld [vmem:[%s4979_s3 + $0x28] sm:$0xff] }
   0x8   :  { %3053 = vmatpush3.msra.mxu0 %v85_v6  ;;  %3298 = vmatpush3.msra.mxu1 %v175_v8  ;;  %v56_v20 = vld [vmem:[%s4979_s3 + $0x20] sm:$0xff]  ;;  %v65_v24 = vld [vmem:[%s4979_s3 + $0x68] sm:$0xff]  ;;  %v66_v25 = vld [vmem:[%s4979_s3 + $0x70] sm:$0xff] }
   0x9   :  { %3055 = vmatmul.mubr.msk.f32.vlgmr.msra.gmra.mxu0 %vm96_vm3, %v51_v7  ;;  %3057 = vmatprep.subr.msk.mxu0 %vm234_vm2, %v177_v3  ;;  %v64_v22 = vld [vmem:[%s4979_s3 + $0x60] sm:$0xff]  ;;  %v67_v26 = vld [vmem:[%s4979_s3 + $0x78] sm:$0xff]  ;;  %v70_v29 = vld [vmem:[%s4981_s1 + $0x8] sm:$0xff] }
   0xa   :  { %3058 = vmatpush3.msk.msra.mxu0 %vm234_vm2, %v177_v3  ;;  %3063 = vmatprep.mubr.msk.f32.mxu0 %vm185_vm4, %v52_v9  ;;  %v69_v28 = vld [vmem:[%s4981_s1] sm:$0xff]  ;;  %v71_v30 = vld [vmem:[%s4981_s1 + $0x10] sm:$0xff]  ;;  %v72_v31 = vld [vmem:[%s4981_s1 + $0x18] sm:$0xff] }
   0xb   :  { %3059 = vmatprep.subr.mxu0 %v176_v5  ;;  %3072 = vmatprep.mubr.msk.f32.mxu1 %vm185_vm4, %v58_v10  ;;  %v73_v32 = vld [vmem:[%s4981_s1 + $0x20] sm:$0xff]  ;;  %v74_v33 = vld [vmem:[%s4981_s1 + $0x28] sm:$0xff]  ;;  %v75_v36 = vld [vmem:[%s4981_s1 + $0x30] sm:$0xff] }
   0xc   :  { %3060 = vmatpush3.msra.mxu0 %v176_v5  ;;  %3073 = vmatmul.mubr.msk.f32.vlgmr.msra.gmra.mxu1 %vm185_vm4, %v59_v11  ;;  %v400_v34 = vld [vmem:[%s4982_s8 + $0x8] sm:$0xff]  ;;  %v399_v35 = vld [vmem:[%s4982_s8] sm:$0xff]  ;;  %v76_v37 = vld [vmem:[%s4981_s1 + $0x38] sm:$0xff] }
   0xd   :  { %3061 = vmatprep.subr.mxu0 %v175_v8  ;;  %3075 = vmatprep.mubr.msk.f32.mxu1 %vm185_vm4, %v60_v12  ;;  %v77_v38 = vld [vmem:[%s4981_s1 + $0x40] sm:$0xff]  ;;  %v78_v39 = vld [vmem:[%s4981_s1 + $0x48] sm:$0xff]  ;;  %v79_v40 = vld [vmem:[%s4981_s1 + $0x50] sm:$0xff] }
   0xe   :  { %3062 = vmatpush3.msra.mxu0 %v175_v8  ;;  %3115 = vmatprep.subr.mxu1 %v4994_v0  ;;  %v80_v41 = vld [vmem:[%s4981_s1 + $0x58] sm:$0xff]  ;;  %v81_v42 = vld [vmem:[%s4981_s1 + $0x60] sm:$0xff]  ;;  %v82_v43 = vld [vmem:[%s4981_s1 + $0x68] sm:$0xff] }
   0xf   :  { %3064 = vmatmul.mubr.msk.f32.vlgmr.msra.gmra.mxu0 %vm185_vm4, %v53_v13  ;;  %3116 = vmatpush3.msra.mxu1 %v603_v14  ;;  %v83_v44 = vld [vmem:[%s4981_s1 + $0x70] sm:$0xff]  ;;  %v84_v45 = vld [vmem:[%s4981_s1 + $0x78] sm:$0xff]  ;;  %v2777_v46 = vld [vmem:[%s4983_s5] ss:$0 sm:$0xff]  ;;  %s3430_s5 = smov 16  }
  0x10   :  { %3066 = vmatprep.mubr.msk.f32.mxu0 %vm185_vm4, %v54_v15  ;;  %3076 = vmatmul.mubr.msk.f32.gmra.mxu1 %vm185_vm4, %v61_v16  ;;  %v2780_v52 = vld [vmem:[%s4984_s7] ss:$0 sm:$0xff] }
  0x11   :  { %3078 = vmatprep.mubr.msk.f32.mxu1 %vm185_vm4, %v62_v17  ;;  %3117 = vmatprep.subr.mxu1 %v4994_v0 }
  0x12   :  { %3118 = vmatpush3.msra.mxu1 %v602_v18  ;;  %3308 = vset.pattern.permute.xlu0 %v4996_v27 }
  0x13   :  { %3067 = vmatmul.mubr.msk.f32.gmra.mxu0 %vm185_vm4, %v55_v19  ;;  %3309 = vset.pattern.permute.xlu1 %v4996_v27 }
  0x14   :  { %3069 = vmatprep.mubr.msk.f32.mxu0 %vm185_vm4, %v56_v20  ;;  %3079 = vmatmul.mubr.msk.f32.gmra.mxu1 %vm185_vm4, %v63_v21 }
  0x15   :  { %3081 = vmatprep.mubr.msk.f32.mxu1 %vm185_vm4, %v64_v22  ;;  %699 = vperm.xlu0 %3308, %v69_v28  }
  0x16   :  { %705 = vperm.xlu1 %3309, %v71_v30   ;;  %3087 = vmatprep.subr.mxu0 %v400_v34 }
  0x17   :  { %3070 = vmatmul.mubr.msk.f32.gmra.mxu0 %vm185_vm4, %v57_v23 }
  0x18   :  { %3082 = vmatmul.mubr.msk.f32.gmra.mxu1 %vm185_vm4, %v65_v24  ;;  %3088 = vmatpush3.msra.mxu0 %v400_v34 }
  0x19   :  { %3084 = vmatprep.mubr.msk.f32.mxu1 %vm185_vm4, %v66_v25  ;;  %702 = vperm.xlu0 %3308, %v70_v29  }
  0x1a   :  { %708 = vperm.xlu1 %3309, %v72_v31   ;;  %3089 = vmatprep.subr.mxu0 %v399_v35 }
  0x1b   :  { %3090 = vmatpush3.msra.mxu0 %v399_v35 }
  0x1c   :  { %3085 = vmatmul.mubr.msk.f32.gmra.mxu1 %vm185_vm4, %v67_v26 }
  0x1d   :  { %3119 = vmatprep.mubr.msk.f32.mxu1 %vm3423_vm1, %v4994_v0  ;;  %711 = vperm.xlu0 %3308, %v73_v32  }
  0x1e   :  { %714 = vperm.xlu1 %3309, %v74_v33  }
  0x21   :  { %717 = vperm.xlu0 %3308, %v75_v36  }
  0x22   :  { %720 = vperm.xlu1 %3309, %v76_v37  }
  0x25   :  { %723 = vperm.xlu0 %3308, %v77_v38   ;;  %v4993_v38 = vlaneseq }
  0x26   :  { %726 = vperm.xlu1 %3309, %v78_v39  }
  0x27   :  { %v3704_v39 = vand.u32 127, %v4993_v38 }
  0x29   :  { %729 = vperm.xlu0 %3308, %v79_v40  }
  0x2a   :  { %732 = vperm.xlu1 %3309, %v80_v41  }
  0x2d   :  { %735 = vperm.xlu0 %3308, %v81_v42   ;;  %v1077_v42 = vld [vmem:[%s4985_s12 + $0x48] sm:$0xff] }
  0x2e   :  { %738 = vperm.xlu1 %3309, %v82_v43   ;;  %v1076_v43 = vld [vmem:[%s4985_s12 + $0x40] sm:$0xff]  ;;  %3148 = vmatprep.subr.mxu0 %v1077_v42 }
  0x31   :  { %741 = vperm.xlu0 %3308, %v83_v44   ;;  %v1075_v44 = vld [vmem:[%s4985_s12 + $0x38] sm:$0xff] }
  0x32   :  { %744 = vperm.xlu1 %3309, %v84_v45   ;;  %v1074_v45 = vld [vmem:[%s4985_s12 + $0x30] sm:$0xff] }
  0x90   :  { %v700_v40 = vpop.permute.xlu0 %699 }
  0x91   :  { %vm746_vm6 = vcmp.eq.s32.totalorder %v3704_v39, %v700_v40 }
  0x92   :  { %v3708_v41 = vsel %vm746_vm6, 1.0, %v4994_v0 }
  0x93   :  { %5073 = vst [vmem:[#allocation3_spill] sm:$0xff] %v3708_v41 }
  0xc9   :  { %v170_v47 = vpop.f32.mrf.mxu0 }
  0xca   :  { %v3678_v48 = vadd.f32 %v2777_v46, %v170_v47  ;;  %v1073_v46 = vld [vmem:[%s4985_s12 + $0x28] sm:$0xff]  ;;  %v1072_v47 = vld [vmem:[%s4985_s12 + $0x20] sm:$0xff] }
  0xcb   :  { %v3056_v49 = vpop.f32.mrf.mxu0 }
  0xcc   :  { %5072 = vst [vmem:[#allocation2_spill] sm:$0xff] %v3678_v48  ;;  %v4992_v50 = vmax.f32 %v3678_v48, 0.0  ;;  %v3074_v51 = vpop.f32.mrf.mxu1  ;;  %v706_v49 = vpop.permute.xlu1 %705 }
  0xcd   :  { %v340_v14 = vadd.f32 %v3074_v51, %v2780_v52  ;;  %v703_v51 = vpop.permute.xlu0 %702  ;;  %vm748_vm8 = vcmp.eq.s32.totalorder %v3704_v39, %v706_v49 }
  0xce   :  { %3120 = vmatmul.mubr.msk.f32.vlgmr.msra.gmra.mxu1 %vm408_vm5, %v4992_v50  ;;  %v334_v53 = vpop.f32.mrf.mxu1  ;;  %vm747_vm9 = vcmp.eq.s32.totalorder %v3704_v39, %v703_v51 }
  0xcf   :  { %v3065_v54 = vpop.f32.mrf.mxu0  ;;  %v335_v9 = vadd.f32 %v2780_v52, %v334_v53  ;;  %v390_v19 = vmax.f32 %v340_v14, 0.0  ;;  %3124 = vmatprep.mubr.msk.f32.mxu1 %vm826_vm7, %v3708_v41 }
  0xd0   :  { %v310_v55 = vadd.f32 %v3065_v54, %v2780_v52  ;;  %v3077_v56 = vpop.f32.mrf.mxu1 }
  0xd1   :  { %v304_v57 = vpop.f32.mrf.mxu0  ;;  %v389_v16 = vmax.f32 %v335_v9, 0.0  ;;  %v350_v20 = vadd.f32 %v3077_v56, %v2780_v52  ;;  %v712_v53 = vpop.permute.xlu0 %711 }
  0xd2   :  { %v305_v58 = vadd.f32 %v2780_v52, %v304_v57  ;;  %v344_v59 = vpop.f32.mrf.mxu1  ;;  %v384_v60 = vmax.f32 %v310_v55, 0.0  ;;  %v2815_v55 = vld [vmem:[%s4986_s11] ss:$0 sm:$0xff]  ;;  %vm750_vm11 = vcmp.eq.s32.totalorder %v3704_v39, %v712_v53 }
  0xd3   :  { %v3068_v61 = vpop.f32.mrf.mxu0  ;;  %v345_v17 = vadd.f32 %v2780_v52, %v344_v59  ;;  %v392_v24 = vmax.f32 %v350_v20, 0.0 }
  0xd4   :  { %v383_v62 = vmax.f32 %v305_v58, 0.0  ;;  %v320_v63 = vadd.f32 %v3068_v61, %v2780_v52  ;;  %v3080_v1 = vpop.f32.mrf.mxu1  ;;  %v3736_v61 = vsel %vm748_vm8, 1.0, %v4994_v0 }
  0xd5   :  { %v314_v2 = vpop.f32.mrf.mxu0  ;;  %v391_v21 = vmax.f32 %v345_v17, 0.0  ;;  %v360_v25 = vadd.f32 %v3080_v1, %v2780_v52  ;;  %v718_v56 = vpop.permute.xlu0 %717  ;;  %5074 = vst [vmem:[#allocation4_spill] sm:$0xff] %v3736_v61 }
  0xd6   :  { %v315_v3 = vadd.f32 %v2780_v52, %v314_v2  ;;  %3091 = vmatprep.mubr.msk.f32.mxu0 %vm408_vm5, %v383_v62  ;;  %v354_v4 = vpop.f32.mrf.mxu1  ;;  %v386_v5 = vmax.f32 %v320_v63, 0.0  ;;  %v3740_v62 = vsel %vm747_vm9, 1.0, %v4994_v0  ;;  %vm752_vm13 = vcmp.eq.s32.totalorder %v3704_v39, %v718_v56 }
  0xd7   :  { %v3071_v6 = vpop.f32.mrf.mxu0  ;;  %3092 = vmatmul.mubr.msk.f32.vlgmr.msra.gmra.mxu0 %vm408_vm5, %v384_v60  ;;  %v355_v22 = vadd.f32 %v2780_v52, %v354_v4  ;;  %v394_v30 = vmax.f32 %v360_v25, 0.0  ;;  %5075 = vst [vmem:[#allocation5_spill] sm:$0xff] %v3740_v62  ;;  %v5002_v25 = vmov 2  }
  0xd8   :  { %v385_v7 = vmax.f32 %v315_v3, 0.0  ;;  %v330_v8 = vadd.f32 %v3071_v6, %v2780_v52  ;;  %v3083_v11 = vpop.f32.mrf.mxu1  ;;  %3149 = vmatpush3.msra.mxu0 %v1077_v42  ;;  %v3752_v3 = vsel %vm750_vm11, 1.0, %v4994_v0  ;;  %v3764_v6 = vsel %vm752_vm13, 1.0, %v4994_v0  ;;  %3311 = vset.pattern.permute.xlu0 %v5002_v25 }
  0xd9   :  { %v324_v10 = vpop.f32.mrf.mxu0  ;;  %v393_v26 = vmax.f32 %v355_v22, 0.0  ;;  %v370_v31 = vadd.f32 %v3083_v11, %v2780_v52  ;;  %3150 = vmatprep.subr.mxu0 %v1076_v43  ;;  %v724_v63 = vpop.permute.xlu0 %723  ;;  %5077 = vst [vmem:[#allocation7_spill] sm:$0xff] %v3752_v3  ;;  %5079 = vst [vmem:[#allocation9_spill] sm:$0xff] %v3764_v6  ;;  %v1070_v22 = vld [vmem:[%s4985_s12 + $0x10] sm:$0xff]  ;;  %vm2375_vm11 = vcmask 1044480   ;;  %vm2210_vm13 = vcmask 15360  }
  0xda   :  { %v325_v12 = vadd.f32 %v2780_v52, %v324_v10  ;;  %3094 = vmatprep.mubr.msk.f32.mxu0 %vm408_vm5, %v385_v7  ;;  %v388_v13 = vmax.f32 %v330_v8, 0.0  ;;  %v364_v18 = vpop.f32.mrf.mxu1  ;;  %3151 = vmatpush3.msra.mxu0 %v1076_v43  ;;  %vm754_vm15 = vcmp.eq.s32.totalorder %v3704_v39, %v724_v63 }
  0xdb   :  { %3095 = vmatmul.mubr.msk.f32.gmra.mxu0 %vm408_vm5, %v386_v5  ;;  %v365_v28 = vadd.f32 %v2780_v52, %v364_v18  ;;  %v396_v34 = vmax.f32 %v370_v31, 0.0  ;;  %3152 = vmatprep.subr.mxu0 %v1075_v44  ;;  %v3776_v9 = vsel %vm754_vm15, 1.0, %v4994_v0  ;;  %vm2244_vm15 = vcmask 31744  }
  0xdc   :  { %v387_v15 = vmax.f32 %v325_v12, 0.0  ;;  %v3086_v23 = vpop.f32.mrf.mxu1  ;;  %3153 = vmatpush3.msra.mxu0 %v1075_v44  ;;  %5081 = vst [vmem:[#allocation11_spill] sm:$0xff] %v3776_v9 }
  0xdd   :  { %v395_v32 = vmax.f32 %v365_v28, 0.0  ;;  %v380_v35 = vadd.f32 %v3086_v23, %v2780_v52  ;;  %3154 = vmatprep.subr.mxu0 %v1074_v45  ;;  %v730_v5 = vpop.permute.xlu0 %729  ;;  %v1069_v23 = vld [vmem:[%s4985_s12 + $0x8] sm:$0xff] }
  0xde   :  { %3097 = vmatprep.mubr.msk.f32.mxu0 %vm408_vm5, %v387_v15  ;;  %v374_v29 = vpop.f32.mrf.mxu1  ;;  %3155 = vmatpush3.msra.mxu0 %v1074_v45  ;;  %vm756_vm2 = vcmp.eq.s32.totalorder %v3704_v39, %v730_v5 }
  0xdf   :  { %3098 = vmatmul.mubr.msk.f32.gmra.mxu0 %vm408_vm5, %v388_v13  ;;  %v375_v33 = vadd.f32 %v2780_v52, %v374_v29  ;;  %v398_v37 = vmax.f32 %v380_v35, 0.0  ;;  %3156 = vmatprep.subr.mxu0 %v1073_v46  ;;  %v709_v52 = vpop.permute.xlu1 %708  ;;  %v3788_v13 = vsel %vm756_vm2, 1.0, %v4994_v0  ;;  %v3840_v35 = vld [vmem:[%s4987_s9] ss:$0 sm:$0xff]  ;;  %vm2770_vm2 = vcmask 785408  }
  0xe0   :  { %3100 = vmatprep.mubr.msk.f32.mxu0 %vm408_vm5, %v389_v16  ;;  %3157 = vmatpush3.msra.mxu0 %v1073_v46  ;;  %vm749_vm10 = vcmp.eq.s32.totalorder %v3704_v39, %v709_v52  ;;  %5083 = vst [vmem:[#allocation13_spill] sm:$0xff] %v3788_v13 }
  0xe1   :  { %v397_v36 = vmax.f32 %v375_v33, 0.0  ;;  %3158 = vmatprep.subr.mxu0 %v1072_v47  ;;  %v3746_v1 = vsel %vm749_vm10, 1.0, %v4994_v0  ;;  %v736_v10 = vpop.permute.xlu0 %735  ;;  %vm1078_vm10 = vcmask 654336  }
  0xe2   :  { %3159 = vmatpush3.msra.mxu0 %v1072_v47  ;;  %5076 = vst [vmem:[#allocation6_spill] sm:$0xff] %v3746_v1  ;;  %vm758_vm4 = vcmp.eq.s32.totalorder %v3704_v39, %v736_v10 }
  0xe3   :  { %3101 = vmatmul.mubr.msk.f32.gmra.mxu0 %vm408_vm5, %v390_v19  ;;  %v715_v54 = vpop.permute.xlu1 %714  ;;  %v3799_v16 = vsel %vm758_vm4, 1.0, %v4994_v0 }
  0xe4   :  { %3103 = vmatprep.mubr.msk.f32.mxu0 %vm408_vm5, %v391_v21  ;;  %vm751_vm12 = vcmp.eq.s32.totalorder %v3704_v39, %v715_v54  ;;  %5085 = vst [vmem:[#allocation15_spill] sm:$0xff] %v3799_v16  ;;  %v1071_v21 = vld [vmem:[%s4985_s12 + $0x18] sm:$0xff] }
  0xe5   :  { %v3758_v4 = vsel %vm751_vm12, 1.0, %v4994_v0  ;;  %v742_v15 = vpop.permute.xlu0 %741  ;;  %3160 = vmatprep.subr.mxu0 %v1071_v21  ;;  %vm2193_vm12 = vcmask 7168  }
  0xe6   :  { %5078 = vst [vmem:[#allocation8_spill] sm:$0xff] %v3758_v4  ;;  %vm760_vm8 = vcmp.eq.s32.totalorder %v3704_v39, %v742_v15  ;;  %3161 = vmatpush3.msra.mxu0 %v1071_v21 }
  0xe7   :  { %3104 = vmatmul.mubr.msk.f32.gmra.mxu0 %vm408_vm5, %v392_v24  ;;  %v721_v60 = vpop.permute.xlu1 %720  ;;  %v3811_v19 = vsel %vm760_vm8, 1.0, %v4994_v0  ;;  %3162 = vmatprep.subr.mxu0 %v1070_v22  ;;  %v1068_v24 = vld [vmem:[%s4985_s12] sm:$0xff] }
  0xe8   :  { %3106 = vmatprep.mubr.msk.f32.mxu0 %vm408_vm5, %v393_v26  ;;  %vm753_vm14 = vcmp.eq.s32.totalorder %v3704_v39, %v721_v60  ;;  %5087 = vst [vmem:[#allocation17_spill] sm:$0xff] %v3811_v19  ;;  %3163 = vmatpush3.msra.mxu0 %v1070_v22 }
  0xe9   :  { %v3770_v7 = vsel %vm753_vm14, 1.0, %v4994_v0  ;;  %3164 = vmatprep.subr.mxu0 %v1069_v23  ;;  %vm2227_vm14 = vcmask 23552  }
  0xea   :  { %5080 = vst [vmem:[#allocation10_spill] sm:$0xff] %v3770_v7  ;;  %3165 = vmatpush3.msra.mxu0 %v1069_v23 }
  0xeb   :  { %3107 = vmatmul.mubr.msk.f32.gmra.mxu0 %vm408_vm5, %v394_v30  ;;  %v727_v2 = vpop.permute.xlu1 %726  ;;  %3166 = vmatprep.subr.mxu0 %v1068_v24 }
  0xec   :  { %3109 = vmatprep.mubr.msk.f32.mxu0 %vm408_vm5, %v395_v32  ;;  %vm755_vm0 = vcmp.eq.s32.totalorder %v3704_v39, %v727_v2  ;;  %3167 = vmatpush3.msra.mxu0 %v1068_v24 }
  0xed   :  { %v3782_v11 = vsel %vm755_vm0, 1.0, %v4994_v0  ;;  %3218 = vmatprep.subr.mxu0 %v4994_v0 }
  0xee   :  { %5082 = vst [vmem:[#allocation12_spill] sm:$0xff] %v3782_v11 }
  0xef   :  { %3110 = vmatmul.mubr.msk.f32.gmra.mxu0 %vm408_vm5, %v396_v34  ;;  %v733_v8 = vpop.permute.xlu1 %732 }
  0xf0   :  { %3112 = vmatprep.mubr.msk.f32.mxu0 %vm408_vm5, %v397_v36  ;;  %vm757_vm3 = vcmp.eq.s32.totalorder %v3704_v39, %v733_v8 }
  0xf1   :  { %v3794_v14 = vsel %vm757_vm3, 1.0, %v4994_v0 }
  0xf2   :  { %5084 = vst [vmem:[#allocation14_spill] sm:$0xff] %v3794_v14 }
  0xf3   :  { %3113 = vmatmul.mubr.msk.f32.gmra.mxu0 %vm408_vm5, %v398_v37  ;;  %v739_v12 = vpop.permute.xlu1 %738 }
  0xf4   :  { %vm759_vm6 = vcmp.eq.s32.totalorder %v3704_v39, %v739_v12 }
  0xf5   :  { %v3808_v18 = vsel %vm759_vm6, 1.0, %v4994_v0 }
  0xf6   :  { %5086 = vst [vmem:[#allocation16_spill] sm:$0xff] %v3808_v18 }
  0xf7   :  { %v745_v17 = vpop.permute.xlu1 %744 }
  0xf8   :  { %vm761_vm9 = vcmp.eq.s32.totalorder %v3704_v39, %v745_v17 }
  0xf9   :  { %v3819_v20 = vsel %vm761_vm9, 1.0, %v4994_v0 }
  0xfa   :  { %5088 = vst [vmem:[#allocation18_spill] sm:$0xff] %v3819_v20 }
 0x18e   :  { %v680_v57 = vpop.f32.mrf.mxu1 }
 0x18f   :  { %v681_v58 = vadd.f32 %v2815_v55, %v680_v57 }
 0x190   :  { %v3121_v59 = vpop.f32.mrf.mxu1 }
 0x191   :  { %3122 = vmatprep.subr.mxu1 %v681_v58 }
 0x192   :  { %3123 = vmatpush3.msra.mxu1 %v681_v58 }
 0x193   :  { %3125 = vmatmul.mubr.msk.f32.vlgmr.msra.gmra.mxu1 %vm826_vm7, %v3740_v62 }
 0x194   :  { %3127 = vmatprep.mubr.msk.f32.mxu1 %vm826_vm7, %v3736_v61 }
 0x197   :  { %3128 = vmatmul.mubr.msk.f32.gmra.mxu1 %vm826_vm7, %v3746_v1  ;;  %v3093_v26 = vpop.f32.mrf.mxu0 }
 0x198   :  { %3130 = vmatprep.mubr.msk.f32.mxu1 %vm826_vm7, %v3752_v3  ;;  %v3843_v37 = vadd.f32 %v3093_v26, %v3840_v35 }
 0x199   :  { %v523_v28 = vpop.f32.mrf.mxu0 }
 0x19a   :  { %5089 = vst [vmem:[#allocation19_spill] sm:$0xff] %v3843_v37  ;;  %v3846_v40 = vadd.f32 %v3840_v35, %v523_v28 }
 0x19b   :  { %3131 = vmatmul.mubr.msk.f32.gmra.mxu1 %vm826_vm7, %v3758_v4  ;;  %v3096_v29 = vpop.f32.mrf.mxu0 }
 0x19c   :  { %3133 = vmatprep.mubr.msk.f32.mxu1 %vm826_vm7, %v3764_v6  ;;  %5090 = vst [vmem:[#allocation20_spill] sm:$0xff] %v3846_v40  ;;  %v3849_v42 = vadd.f32 %v3096_v29, %v3840_v35 }
 0x19d   :  { %v533_v30 = vpop.f32.mrf.mxu0 }
 0x19e   :  { %5091 = vst [vmem:[#allocation21_spill] sm:$0xff] %v3849_v42  ;;  %v3853_v46 = vadd.f32 %v3840_v35, %v533_v30 }
 0x19f   :  { %3134 = vmatmul.mubr.msk.f32.gmra.mxu1 %vm826_vm7, %v3770_v7  ;;  %v3099_v31 = vpop.f32.mrf.mxu0 }
 0x1a0   :  { %3136 = vmatprep.mubr.msk.f32.mxu1 %vm826_vm7, %v3776_v9  ;;  %5092 = vst [vmem:[#allocation22_spill] sm:$0xff] %v3853_v46  ;;  %v3857_v52 = vadd.f32 %v3099_v31, %v3840_v35 }
 0x1a1   :  { %v543_v32 = vpop.f32.mrf.mxu0 }
 0x1a2   :  { %5093 = vst [vmem:[#allocation23_spill] sm:$0xff] %v3857_v52  ;;  %v3861_v57 = vadd.f32 %v3840_v35, %v543_v32 }
 0x1a3   :  { %3137 = vmatmul.mubr.msk.f32.gmra.mxu1 %vm826_vm7, %v3782_v11  ;;  %v3102_v33 = vpop.f32.mrf.mxu0 }
 0x1a4   :  { %3139 = vmatprep.mubr.msk.f32.mxu1 %vm826_vm7, %v3788_v13  ;;  %5094 = vst [vmem:[#allocation24_spill] sm:$0xff] %v3861_v57  ;;  %v3868_v17 = vadd.f32 %v3102_v33, %v3840_v35 }
 0x1a5   :  { %v553_v34 = vpop.f32.mrf.mxu0 }
 0x1a6   :  { %5095 = vst [vmem:[#allocation25_spill] sm:$0xff] %v3868_v17  ;;  %v3872_v26 = vadd.f32 %v3840_v35, %v553_v34 }
 0x1a7   :  { %3140 = vmatmul.mubr.msk.f32.gmra.mxu1 %vm826_vm7, %v3794_v14  ;;  %v3105_v36 = vpop.f32.mrf.mxu0 }
 0x1a8   :  { %3142 = vmatprep.mubr.msk.f32.mxu1 %vm826_vm7, %v3799_v16  ;;  %5096 = vst [vmem:[#allocation26_spill] sm:$0xff] %v3872_v26  ;;  %v3878_v33 = vadd.f32 %v3105_v36, %v3840_v35 }
 0x1a9   :  { %v563_v44 = vpop.f32.mrf.mxu0 }
 0x1aa   :  { %5097 = vst [vmem:[#allocation27_spill] sm:$0xff] %v3878_v33  ;;  %v3882_v34 = vadd.f32 %v3840_v35, %v563_v44 }
 0x1ab   :  { %3143 = vmatmul.mubr.msk.f32.gmra.mxu1 %vm826_vm7, %v3808_v18  ;;  %v3108_v55 = vpop.f32.mrf.mxu0 }
 0x1ac   :  { %3145 = vmatprep.mubr.msk.f32.mxu1 %vm826_vm7, %v3811_v19  ;;  %5098 = vst [vmem:[#allocation28_spill] sm:$0xff] %v3882_v34  ;;  %v3888_v36 = vadd.f32 %v3108_v55, %v3840_v35 }
 0x1ad   :  { %v573_v10 = vpop.f32.mrf.mxu0 }
 0x1ae   :  { %5099 = vst [vmem:[#allocation29_spill] sm:$0xff] %v3888_v36  ;;  %v3892_v44 = vadd.f32 %v3840_v35, %v573_v10 }
 0x1af   :  { %3146 = vmatmul.mubr.msk.f32.gmra.mxu1 %vm826_vm7, %v3819_v20  ;;  %v3111_v30 = vpop.f32.mrf.mxu0 }
 0x1b0   :  { %5100 = vst [vmem:[#allocation30_spill] sm:$0xff] %v3892_v44  ;;  %v3898_v55 = vadd.f32 %v3111_v30, %v3840_v35 }
 0x1b2   :  { %5101 = vst [vmem:[#allocation31_spill] sm:$0xff] %v3898_v55 }
 0x253   :  { %v3126_v39 = vpop.f32.mrf.mxu1 }
 0x254   :  { %v1021_v43 = vadd.f32 %v3126_v39, %v3843_v37 }
 0x255   :  { %v941_v45 = vpop.f32.mrf.mxu1 }
 0x256   :  { %v1020_v47 = vadd.f32 %v941_v45, %v3846_v40  ;;  %v1037_v49 = vmul.f32 0.2, %v1021_v43 }
 0x257   :  { %v3129_v51 = vpop.f32.mrf.mxu1 }
 0x258   :  { %v1036_v53 = vmul.f32 0.2, %v1020_v47  ;;  %v1023_v54 = vadd.f32 %v3129_v51, %v3849_v42  ;;  %v1053_v63 = vmax.f32 %v1021_v43, %v1037_v49 }
 0x259   :  { %v951_v56 = vpop.f32.mrf.mxu1 }
 0x25a   :  { %v1052_v58 = vmax.f32 %v1020_v47, %v1036_v53  ;;  %v1039_v59 = vmul.f32 0.2, %v1023_v54  ;;  %v1022_v60 = vadd.f32 %v951_v56, %v3853_v46  ;;  %v583_v53 = vpop.f32.mrf.mxu0  ;;  %v5120_v46 = vmov 1  }
 0x25b   :  { %v3132_v2 = vpop.f32.mrf.mxu1  ;;  %v3902_v10 = vadd.f32 %v3840_v35, %v583_v53 }
 0x25c   :  { %v1038_v5 = vmul.f32 0.2, %v1022_v60  ;;  %v1025_v8 = vadd.f32 %v3132_v2, %v3857_v52  ;;  %3168 = vmatprep.mubr.msk.f32.mxu0 %vm1078_vm10, %v1052_v58  ;;  %v1055_v12 = vmax.f32 %v1023_v54, %v1039_v59 }
 0x25d   :  { %v961_v15 = vpop.f32.mrf.mxu1  ;;  %3169 = vmatmul.mubr.msk.f32.vlgmr.msra.gmra.mxu0 %vm1078_vm10, %v1053_v63  ;;  %5102 = vst [vmem:[#allocation32_spill] sm:$0xff] %v3902_v10 }
 0x25e   :  { %v1054_v21 = vmax.f32 %v1022_v60, %v1038_v5  ;;  %v1041_v22 = vmul.f32 0.2, %v1025_v8  ;;  %v1024_v23 = vadd.f32 %v961_v15, %v3861_v57 }
 0x25f   :  { %v3135_v24 = vpop.f32.mrf.mxu1 }
 0x260   :  { %v1040_v28 = vmul.f32 0.2, %v1024_v23  ;;  %v1027_v29 = vadd.f32 %v3135_v24, %v3868_v17  ;;  %3171 = vmatprep.mubr.msk.f32.mxu0 %vm1078_vm10, %v1054_v21  ;;  %v1057_v31 = vmax.f32 %v1025_v8, %v1041_v22  ;;  %v3114_v8 = vpop.f32.mrf.mxu0 }
 0x261   :  { %v971_v32 = vpop.f32.mrf.mxu1  ;;  %3172 = vmatmul.mubr.msk.f32.gmra.mxu0 %vm1078_vm10, %v1055_v12  ;;  %v3908_v30 = vadd.f32 %v3114_v8, %v3840_v35 }
 0x262   :  { %v1056_v39 = vmax.f32 %v1024_v23, %v1040_v28  ;;  %v1026_v43 = vadd.f32 %v971_v32, %v3872_v26  ;;  %v1043_v45 = vmul.f32 0.2, %v1027_v29 }
 0x263   :  { %v3138_v47 = vpop.f32.mrf.mxu1  ;;  %5103 = vst [vmem:[#allocation33_spill] sm:$0xff] %v3908_v30 }
 0x264   :  { %v1042_v49 = vmul.f32 0.2, %v1026_v43  ;;  %v1029_v51 = vadd.f32 %v3138_v47, %v3878_v33  ;;  %3174 = vmatprep.mubr.msk.f32.mxu0 %vm1078_vm10, %v1056_v39  ;;  %v1059_v59 = vmax.f32 %v1027_v29, %v1043_v45 }
 0x265   :  { %v981_v54 = vpop.f32.mrf.mxu1  ;;  %3175 = vmatmul.mubr.msk.f32.gmra.mxu0 %vm1078_vm10, %v1057_v31  ;;  %v593_v31 = vpop.f32.mrf.mxu0 }
 0x266   :  { %v1058_v56 = vmax.f32 %v1026_v43, %v1042_v49  ;;  %v1028_v58 = vadd.f32 %v981_v54, %v3882_v34  ;;  %v1045_v60 = vmul.f32 0.2, %v1029_v51  ;;  %v5123_v34 = vmov 0  }
 0x267   :  { %v3141_v63 = vpop.f32.mrf.mxu1 }
 0x268   :  { %v1044_v2 = vmul.f32 0.2, %v1028_v58  ;;  %v1031_v5 = vadd.f32 %v3141_v63, %v3888_v36  ;;  %3177 = vmatprep.mubr.msk.f32.mxu0 %vm1078_vm10, %v1058_v56  ;;  %v1061_v22 = vmax.f32 %v1029_v51, %v1045_v60  ;;  %v3912_v51 = vadd.f32 %v3840_v35, %v593_v31 }
 0x269   :  { %v991_v12 = vpop.f32.mrf.mxu1  ;;  %3178 = vmatmul.mubr.msk.f32.gmra.mxu0 %vm1078_vm10, %v1059_v59  ;;  %v5124_v36 = vmov 4  }
 0x26a   :  { %v1060_v15 = vmax.f32 %v1028_v58, %v1044_v2  ;;  %v1030_v21 = vadd.f32 %v991_v12, %v3892_v44  ;;  %v1047_v23 = vmul.f32 0.2, %v1031_v5  ;;  %5104 = vst [vmem:[#allocation34_spill] sm:$0xff] %v3912_v51 }
 0x26b   :  { %v3144_v24 = vpop.f32.mrf.mxu1 }
 0x26c   :  { %v1046_v28 = vmul.f32 0.2, %v1030_v21  ;;  %v1033_v29 = vadd.f32 %v3144_v24, %v3898_v55  ;;  %3180 = vmatprep.mubr.msk.f32.mxu0 %vm1078_vm10, %v1060_v15  ;;  %v1063_v45 = vmax.f32 %v1031_v5, %v1047_v23  ;;  %v4999_v15 = vmov 1  }
 0x26d   :  { %v1001_v32 = vpop.f32.mrf.mxu1  ;;  %3181 = vmatmul.mubr.msk.f32.gmra.mxu0 %vm1078_vm10, %v1061_v22  ;;  %v5011_v22 = vmov 4  }
 0x26e   :  { %v1062_v39 = vmax.f32 %v1030_v21, %v1046_v28  ;;  %v1032_v43 = vadd.f32 %v1001_v32, %v3902_v10  ;;  %v1049_v47 = vmul.f32 0.2, %v1033_v29  ;;  %v5007_v21 = vmov 3  }
 0x26f   :  { %v3147_v49 = vpop.f32.mrf.mxu1 }
 0x270   :  { %v1048_v53 = vmul.f32 0.2, %v1032_v43  ;;  %v1035_v54 = vadd.f32 %v3147_v49, %v3908_v30  ;;  %3183 = vmatprep.mubr.msk.f32.mxu0 %vm1078_vm10, %v1062_v39  ;;  %v1065_v60 = vmax.f32 %v1033_v29, %v1049_v47 }
 0x271   :  { %v1011_v56 = vpop.f32.mrf.mxu1  ;;  %3184 = vmatmul.mubr.msk.f32.gmra.mxu0 %vm1078_vm10, %v1063_v45 }
 0x272   :  { %v1064_v58 = vmax.f32 %v1032_v43, %v1048_v53  ;;  %v1034_v59 = vadd.f32 %v1011_v56, %v3912_v51  ;;  %v1051_v63 = vmul.f32 0.2, %v1035_v54 }
 0x274   :  { %v1050_v2 = vmul.f32 0.2, %v1034_v59  ;;  %3186 = vmatprep.mubr.msk.f32.mxu0 %vm1078_vm10, %v1064_v58  ;;  %v1067_v5 = vmax.f32 %v1035_v54, %v1051_v63 }
 0x275   :  { %3187 = vmatmul.mubr.msk.f32.gmra.mxu0 %vm1078_vm10, %v1065_v60 }
 0x276   :  { %v1066_v35 = vmax.f32 %v1034_v59, %v1050_v2 }
 0x278   :  { %3189 = vmatprep.mubr.msk.f32.mxu0 %vm1078_vm10, %v1066_v35 }
 0x279   :  { %3190 = vmatmul.mubr.msk.f32.gmra.mxu0 %vm1078_vm10, %v1067_v5 }
 0x27a   :  { %3250 = vmatprep.mubr.msk.f32.mxu0 %vm3423_vm1, %v4994_v0 }
 0x31d   :  { %v3924_v8 = vpop.f32.mrf.mxu0 }
 0x31e   :  { %5105 = vst [vmem:[#allocation35_spill] sm:$0xff] %v3924_v8  ;;  %1655 = vperm.xlu0 %3311, %v3924_v8   ;;  %1279 = vperm.xlu1 %3309, %v3924_v8  }
 0x31f   :  { %v3928_v12 = vpop.f32.mrf.mxu0 }
 0x320   :  { %5106 = vst [vmem:[#allocation36_spill] sm:$0xff] %v3928_v12 }
 0x321   :  { %v3946_v23 = vpop.f32.mrf.mxu0 }
 0x322   :  { %3314 = vset.pattern.permute.xlu0 %v4996_v27  ;;  %3310 = vset.pattern.permute.xlu1 %v4999_v15  ;;  %5107 = vst [vmem:[#allocation37_spill] sm:$0xff] %v3946_v23 }
 0x323   :  { %1474 = vperm.xlu1 %3310, %v3924_v8   ;;  %1274 = vperm.xlu0 %3314, %v3928_v12   ;;  %v3956_v24 = vpop.f32.mrf.mxu0 }
 0x324   :  { %5108 = vst [vmem:[#allocation38_spill] sm:$0xff] %v3956_v24 }
 0x325   :  { %v3966_v28 = vpop.f32.mrf.mxu0 }
 0x326   :  { %5109 = vst [vmem:[#allocation39_spill] sm:$0xff] %v3966_v28 }
 0x327   :  { %3312 = vset.pattern.permute.xlu1 %v5007_v21  ;;  %3315 = vset.pattern.permute.xlu0 %v4999_v15  ;;  %v3980_v29 = vpop.f32.mrf.mxu0 }
 0x328   :  { %1836 = vperm.xlu1 %3312, %v3924_v8   ;;  %1470 = vperm.xlu0 %3315, %v3928_v12   ;;  %5110 = vst [vmem:[#allocation40_spill] sm:$0xff] %v3980_v29 }
 0x329   :  { %v3990_v31 = vpop.f32.mrf.mxu0 }
 0x32a   :  { %5111 = vst [vmem:[#allocation41_spill] sm:$0xff] %v3990_v31 }
 0x32b   :  { %v4004_v32 = vpop.f32.mrf.mxu0 }
 0x32c   :  { %3313 = vset.pattern.permute.xlu1 %v5011_v22  ;;  %3317 = vset.pattern.permute.xlu0 %v5007_v21  ;;  %5112 = vst [vmem:[#allocation42_spill] sm:$0xff] %v4004_v32 }
 0x32d   :  { %2017 = vperm.xlu1 %3313, %v3924_v8   ;;  %1832 = vperm.xlu0 %3317, %v3928_v12   ;;  %v4014_v39 = vpop.f32.mrf.mxu0 }
 0x32e   :  { %5113 = vst [vmem:[#allocation43_spill] sm:$0xff] %v4014_v39 }
 0x32f   :  { %v4028_v43 = vpop.f32.mrf.mxu0 }
 0x330   :  { %5114 = vst [vmem:[#allocation44_spill] sm:$0xff] %v4028_v43 }
 0x331   :  { %3316 = vset.pattern.permute.xlu1 %v5002_v25  ;;  %3318 = vset.pattern.permute.xlu0 %v5011_v22  ;;  %v4034_v45 = vpop.f32.mrf.mxu0 }
 0x332   :  { %1651 = vperm.xlu1 %3316, %v3928_v12   ;;  %2013 = vperm.xlu0 %3318, %v3928_v12   ;;  %5115 = vst [vmem:[#allocation45_spill] sm:$0xff] %v4034_v45 }
 0x333   :  { %v4040_v47 = vpop.f32.mrf.mxu0 }
 0x334   :  { %5116 = vst [vmem:[#allocation46_spill] sm:$0xff] %v4040_v47 }
 0x335   :  { %v4045_v49 = vpop.f32.mrf.mxu0 }
 0x336   :  { %3319 = vset.pattern.permute.xlu1 %v4996_v27  ;;  %3320 = vset.pattern.permute.xlu0 %v4999_v15  ;;  %5117 = vst [vmem:[#allocation47_spill] sm:$0xff] %v4045_v49 }
 0x337   :  { %1482 = vperm.xlu0 %3320, %v3946_v23   ;;  %1289 = vperm.xlu1 %3319, %v3946_v23   ;;  %v4058_v56 = vpop.f32.mrf.mxu0 }
 0x338   :  { %5118 = vst [vmem:[#allocation48_spill] sm:$0xff] %v4058_v56 }
 0x339   :  { %v4080_v2 = vpop.f32.mrf.mxu0 }
 0x33a   :  { %5119 = vst [vmem:[#allocation49_spill] sm:$0xff] %v4080_v2 }
 0x33b   :  { %3322 = vset.pattern.permute.xlu0 %v5007_v21  ;;  %3321 = vset.pattern.permute.xlu1 %v5002_v25 }
 0x33c   :  { %1844 = vperm.xlu0 %3322, %v3946_v23   ;;  %1663 = vperm.xlu1 %3321, %v3946_v23  }
 0x340   :  { %3323 = vset.pattern.permute.xlu0 %v5011_v22  ;;  %3325 = vset.pattern.permute.xlu1 %v4999_v15 }
 0x341   :  { %2025 = vperm.xlu0 %3323, %v3946_v23   ;;  %1478 = vperm.xlu1 %3325, %v3956_v24  }
 0x345   :  { %3324 = vset.pattern.permute.xlu0 %v4996_v27  ;;  %3326 = vset.pattern.permute.xlu1 %v5002_v25 }
 0x346   :  { %1659 = vperm.xlu1 %3326, %v3956_v24   ;;  %1284 = vperm.xlu0 %3324, %v3956_v24  }
 0x34a   :  { %3327 = vset.pattern.permute.xlu1 %v5007_v21  ;;  %3330 = vset.pattern.permute.xlu0 %v4999_v15 }
 0x34b   :  { %1840 = vperm.xlu1 %3327, %v3956_v24   ;;  %1490 = vperm.xlu0 %3330, %v3966_v28  }
 0x34f   :  { %3328 = vset.pattern.permute.xlu1 %v5011_v22  ;;  %3332 = vset.pattern.permute.xlu0 %v5007_v21 }
 0x350   :  { %2021 = vperm.xlu1 %3328, %v3956_v24   ;;  %1852 = vperm.xlu0 %3332, %v3966_v28  }
 0x354   :  { %3329 = vset.pattern.permute.xlu1 %v4996_v27  ;;  %3333 = vset.pattern.permute.xlu0 %v5011_v22 }
 0x355   :  { %2033 = vperm.xlu0 %3333, %v3966_v28   ;;  %1299 = vperm.xlu1 %3329, %v3966_v28  }
 0x359   :  { %3334 = vset.pattern.permute.xlu0 %v4996_v27  ;;  %3331 = vset.pattern.permute.xlu1 %v5002_v25 }
 0x35a   :  { %1671 = vperm.xlu1 %3331, %v3966_v28   ;;  %1294 = vperm.xlu0 %3334, %v3980_v29  }
 0x35e   :  { %3335 = vset.pattern.permute.xlu1 %v4999_v15  ;;  %3336 = vset.pattern.permute.xlu0 %v5002_v25 }
 0x35f   :  { %1486 = vperm.xlu1 %3335, %v3980_v29   ;;  %1667 = vperm.xlu0 %3336, %v3980_v29  }
 0x363   :  { %3337 = vset.pattern.permute.xlu1 %v5007_v21  ;;  %3340 = vset.pattern.permute.xlu0 %v4999_v15 }
 0x364   :  { %1848 = vperm.xlu1 %3337, %v3980_v29   ;;  %1498 = vperm.xlu0 %3340, %v3990_v31  }
 0x368   :  { %3338 = vset.pattern.permute.xlu1 %v5011_v22  ;;  %3342 = vset.pattern.permute.xlu0 %v5007_v21 }
 0x369   :  { %2029 = vperm.xlu1 %3338, %v3980_v29   ;;  %1860 = vperm.xlu0 %3342, %v3990_v31  }
 0x36d   :  { %3339 = vset.pattern.permute.xlu1 %v4996_v27  ;;  %3343 = vset.pattern.permute.xlu0 %v5011_v22 }
 0x36e   :  { %2041 = vperm.xlu0 %3343, %v3990_v31   ;;  %1309 = vperm.xlu1 %3339, %v3990_v31  }
 0x372   :  { %3344 = vset.pattern.permute.xlu0 %v4996_v27  ;;  %3341 = vset.pattern.permute.xlu1 %v5002_v25 }
 0x373   :  { %1679 = vperm.xlu1 %3341, %v3990_v31   ;;  %1304 = vperm.xlu0 %3344, %v4004_v32  }
 0x377   :  { %3345 = vset.pattern.permute.xlu1 %v4999_v15  ;;  %3346 = vset.pattern.permute.xlu0 %v5002_v25 }
 0x378   :  { %1494 = vperm.xlu1 %3345, %v4004_v32   ;;  %1675 = vperm.xlu0 %3346, %v4004_v32  }
 0x37c   :  { %3347 = vset.pattern.permute.xlu1 %v5007_v21  ;;  %3350 = vset.pattern.permute.xlu0 %v4999_v15 }
 0x37d   :  { %1856 = vperm.xlu1 %3347, %v4004_v32   ;;  %1506 = vperm.xlu0 %3350, %v4014_v39  }
 0x381   :  { %3348 = vset.pattern.permute.xlu1 %v5011_v22  ;;  %3351 = vset.pattern.permute.xlu0 %v5002_v25 }
 0x382   :  { %2037 = vperm.xlu1 %3348, %v4004_v32   ;;  %1687 = vperm.xlu0 %3351, %v4014_v39  }
 0x386   :  { %3349 = vset.pattern.permute.xlu1 %v4996_v27  ;;  %3352 = vset.pattern.permute.xlu0 %v5007_v21 }
 0x387   :  { %1868 = vperm.xlu0 %3352, %v4014_v39   ;;  %1319 = vperm.xlu1 %3349, %v4014_v39  }
 0x38b   :  { %3353 = vset.pattern.permute.xlu0 %v5011_v22  ;;  %3355 = vset.pattern.permute.xlu1 %v4999_v15 }
 0x38c   :  { %2049 = vperm.xlu0 %3353, %v4014_v39   ;;  %1502 = vperm.xlu1 %3355, %v4028_v43  }
 0x390   :  { %3354 = vset.pattern.permute.xlu0 %v4996_v27  ;;  %3356 = vset.pattern.permute.xlu1 %v5002_v25 }
 0x391   :  { %1683 = vperm.xlu1 %3356, %v4028_v43   ;;  %1314 = vperm.xlu0 %3354, %v4028_v43  }
 0x395   :  { %3357 = vset.pattern.permute.xlu1 %v5007_v21  ;;  %1329 = vperm.xlu0 %3354, %v4034_v45  }
 0x396   :  { %1864 = vperm.xlu1 %3357, %v4028_v43  }
 0x399   :  { %v4047_v53 = vpop.permute.xlu1 %1279  ;;  %1339 = vperm.xlu0 %3354, %v4045_v49   ;;  %v4076_v63 = vpop.permute.xlu0 %1655 }
 0x39a   :  { %3358 = vset.pattern.permute.xlu1 %v5011_v22 }
 0x39b   :  { %2045 = vperm.xlu1 %3358, %v4028_v43  }
 0x39d   :  { %3371 = vset.pattern.permute.xlu0 %v5011_v22 }
 0x39e   :  { %v4053_v54 = vpop.permute.xlu1 %1474  ;;  %2065 = vperm.xlu0 %3371, %v4045_v49   ;;  %v4087_v5 = vpop.permute.xlu0 %1274 }
 0x39f   :  { %3359 = vset.pattern.permute.xlu1 %v4999_v15 }
 0x3a0   :  { %1514 = vperm.xlu1 %3359, %v4034_v45  }
 0x3a2   :  { %3373 = vset.pattern.permute.xlu0 %v4999_v15 }
 0x3a3   :  { %v4061_v58 = vpop.permute.xlu1 %1836  ;;  %1518 = vperm.xlu0 %3373, %v4058_v56   ;;  %v4096_v38 = vpop.permute.xlu0 %1470 }
 0x3a4   :  { %3360 = vset.pattern.permute.xlu1 %v5002_v25 }
 0x3a5   :  { %1695 = vperm.xlu1 %3360, %v4034_v45  }
 0x3a7   :  { %3374 = vset.pattern.permute.xlu0 %v5002_v25 }
 0x3a8   :  { %v4067_v59 = vpop.permute.xlu1 %2017  ;;  %1699 = vperm.xlu0 %3374, %v4058_v56  }
 0x3a9   :  { %3361 = vset.pattern.permute.xlu1 %v5007_v21 }
 0x3aa   :  { %1876 = vperm.xlu1 %3361, %v4034_v45  }
 0x3ac   :  { %3375 = vset.pattern.permute.xlu0 %v5007_v21 }
 0x3ad   :  { %v4073_v60 = vpop.permute.xlu1 %1651  ;;  %1880 = vperm.xlu0 %3375, %v4058_v56  }
 0x3ae   :  { %3362 = vset.pattern.permute.xlu1 %v5011_v22 }
 0x3af   :  { %2057 = vperm.xlu1 %3362, %v4034_v45   ;;  %v4159_v45 = vpop.f32.mrf.mxu0 }
 0x3b0   :  { %5125 = vst [vmem:[#allocation50_spill] sm:$0xff] %v4159_v45 }
 0x3b1   :  { %3378 = vset.pattern.permute.xlu0 %v4999_v15 }
 0x3b2   :  { %v4083_v35 = vpop.permute.xlu1 %1289  ;;  %1530 = vperm.xlu0 %3378, %v4080_v2  }
 0x3b3   :  { %3363 = vset.pattern.permute.xlu1 %v4996_v27  ;;  %v4104_v27 = vpop.permute.xlu0 %1832 }
 0x3b4   :  { %1324 = vperm.xlu1 %3363, %v4040_v47  }
 0x3b6   :  { %3379 = vset.pattern.permute.xlu0 %v5002_v25 }
 0x3b7   :  { %v4091_v50 = vpop.permute.xlu1 %1663  ;;  %1711 = vperm.xlu0 %3379, %v4080_v2  }
 0x3b8   :  { %3364 = vset.pattern.permute.xlu1 %v4999_v15  ;;  %v4111_v15 = vpop.permute.xlu0 %2013 }
 0x3b9   :  { %1510 = vperm.xlu1 %3364, %v4040_v47  }
 0x3bb   :  { %3380 = vset.pattern.permute.xlu0 %v5007_v21 }
 0x3bc   :  { %v4099_v0 = vpop.permute.xlu1 %1478  ;;  %1892 = vperm.xlu0 %3380, %v4080_v2   ;;  %v4119_v37 = vpop.permute.xlu0 %1482 }
 0x3bd   :  { %3365 = vset.pattern.permute.xlu1 %v5002_v25 }
 0x3be   :  { %1691 = vperm.xlu1 %3365, %v4040_v47  }
 0x3c0   :  { %3387 = vset.pattern.permute.xlu0 %v5011_v22  ;;  %v4126_v57 = vpop.permute.xlu0 %1844 }
 0x3c1   :  { %v4107_v48 = vpop.permute.xlu1 %1659 }
 0x3c2   :  { %3366 = vset.pattern.permute.xlu1 %v5007_v21  ;;  %v5121_v21 = vmov 2  }
 0x3c3   :  { %1872 = vperm.xlu1 %3366, %v4040_v47  }
 0x3c4   :  { %v4133_v26 = vpop.permute.xlu0 %2025 }
 0x3c6   :  { %v4113_v40 = vpop.permute.xlu1 %1840 }
 0x3c7   :  { %3367 = vset.pattern.permute.xlu1 %v5011_v22  ;;  %v5122_v22 = vmov 3  }
 0x3c8   :  { %2053 = vperm.xlu1 %3367, %v4040_v47   ;;  %v4139_v33 = vpop.permute.xlu0 %1284 }
 0x3cb   :  { %v4117_v25 = vpop.permute.xlu1 %2021 }
 0x3cc   :  { %3368 = vset.pattern.permute.xlu1 %v5120_v46  ;;  %v4145_v10 = vpop.permute.xlu0 %1490 }
 0x3cd   :  { %1522 = vperm.xlu1 %3368, %v4045_v49  }
 0x3d0   :  { %v4123_v42 = vpop.permute.xlu1 %1299  ;;  %v4153_v30 = vpop.permute.xlu0 %1852 }
 0x3d1   :  { %3369 = vset.pattern.permute.xlu1 %v5121_v21 }
 0x3d2   :  { %1703 = vperm.xlu1 %3369, %v4045_v49  }
 0x3d5   :  { %v4129_v52 = vpop.permute.xlu1 %1671 }
 0x3d6   :  { %3370 = vset.pattern.permute.xlu1 %v5122_v22 }
 0x3d7   :  { %1884 = vperm.xlu1 %3370, %v4045_v49  }
 0x3da   :  { %v4135_v17 = vpop.permute.xlu1 %1486 }
 0x3db   :  { %3372 = vset.pattern.permute.xlu1 %v5123_v34 }
 0x3dc   :  { %1334 = vperm.xlu1 %3372, %v4058_v56  }
 0x3df   :  { %v4141_v44 = vpop.permute.xlu1 %1848 }
 0x3e0   :  { %3376 = vset.pattern.permute.xlu1 %v5124_v36 }
 0x3e1   :  { %2061 = vperm.xlu1 %3376, %v4058_v56   ;;  %v4162_v56 = vpop.permute.xlu0 %2033 }
 0x3e4   :  { %v4147_v55 = vpop.permute.xlu1 %2029 }
 0x3e5   :  { %3377 = vset.pattern.permute.xlu1 %v5123_v34  ;;  %v4169_v39 = vpop.permute.xlu0 %1294 }
 0x3e6   :  { %1349 = vperm.xlu1 %3377, %v4080_v2  }
 0x3e9   :  { %v4151_v51 = vpop.permute.xlu1 %1309 }
 0x3ea   :  { %3381 = vset.pattern.permute.xlu1 %v5124_v36 }
 0x3eb   :  { %2073 = vperm.xlu1 %3381, %v4080_v2   ;;  %v4175_v2 = vpop.permute.xlu0 %1667 }
 0x3ee   :  { %v4157_v49 = vpop.permute.xlu1 %1679 }
 0x3ef   :  { %3382 = vset.pattern.permute.xlu1 %v5123_v34  ;;  %v4181_v31 = vpop.permute.xlu0 %1498 }
 0x3f0   :  { %1344 = vperm.xlu1 %3382, %v4159_v45  }
 0x3f3   :  { %v4165_v47 = vpop.permute.xlu1 %1494 }
 0x3f4   :  { %3383 = vset.pattern.permute.xlu1 %v5120_v46 }
 0x3f5   :  { %1526 = vperm.xlu1 %3383, %v4159_v45  }
 0x3f8   :  { %v4171_v43 = vpop.permute.xlu1 %1856 }
 0x3f9   :  { %5126 = vst [vmem:[#allocation51_spill] sm:$0xff] %v4171_v43  ;;  %3384 = vset.pattern.permute.xlu1 %v5121_v21  ;;  %v4189_v21 = vpop.permute.xlu0 %1860 }
 0x3fa   :  { %1707 = vperm.xlu1 %3384, %v4159_v45  }
 0x3fd   :  { %v4177_v34 = vpop.permute.xlu1 %2037  ;;  %v4193_v29 = vpop.permute.xlu0 %2041 }
 0x3fe   :  { %5127 = vst [vmem:[#allocation52_spill] sm:$0xff] %v4177_v34  ;;  %3385 = vset.pattern.permute.xlu1 %v5122_v22 }
 0x3ff   :  { %1888 = vperm.xlu1 %3385, %v4159_v45  }
 0x401   :  { %v4197_v22 = vpop.permute.xlu0 %1304 }
 0x402   :  { %v4183_v46 = vpop.permute.xlu1 %1319  ;;  %5132 = vst [vmem:[#allocation57_spill] sm:$0xff] %v4197_v22 }
 0x403   :  { %5128 = vst [vmem:[#allocation53_spill] sm:$0xff] %v4183_v46  ;;  %3386 = vset.pattern.permute.xlu1 %v5124_v36 }
 0x404   :  { %2069 = vperm.xlu1 %3386, %v4159_v45  }
 0x405   :  { %v4201_v8 = vpop.permute.xlu0 %1675 }
 0x406   :  { %5134 = vst [vmem:[#allocation59_spill] sm:$0xff] %v4201_v8 }
 0x407   :  { %v4187_v32 = vpop.permute.xlu1 %1502 }
 0x408   :  { %5129 = vst [vmem:[#allocation54_spill] sm:$0xff] %v4187_v32 }
 0x409   :  { %v4205_v36 = vpop.permute.xlu0 %1506 }
 0x40a   :  { %5136 = vst [vmem:[#allocation61_spill] sm:$0xff] %v4205_v36  ;;  %v2835_v36 = vadd.f32 -1.0, %v3708_v41  ;;  %v2849_v41 = vadd.f32 -1.0, %v3811_v19 }
 0x40c   :  { %v4191_v28 = vpop.permute.xlu1 %1683 }
 0x40d   :  { %5130 = vst [vmem:[#allocation55_spill] sm:$0xff] %v4191_v28  ;;  %v4211_v46 = vpop.permute.xlu0 %1687 }
 0x40e   :  { %5139 = vst [vmem:[#allocation64_spill] sm:$0xff] %v4211_v46 }
 0x411   :  { %v4195_v23 = vpop.permute.xlu1 %1864  ;;  %v4215_v34 = vpop.permute.xlu0 %1868 }
 0x412   :  { %5131 = vst [vmem:[#allocation56_spill] sm:$0xff] %v4195_v23  ;;  %5141 = vst [vmem:[#allocation66_spill] sm:$0xff] %v4215_v34 }
 0x415   :  { %v4219_v43 = vpop.permute.xlu0 %2049 }
 0x416   :  { %v4199_v24 = vpop.permute.xlu1 %2045  ;;  %5143 = vst [vmem:[#allocation68_spill] sm:$0xff] %v4219_v43  ;;  %v2845_v43 = vadd.f32 -1.0, %v3788_v13 }
 0x417   :  { %5133 = vst [vmem:[#allocation58_spill] sm:$0xff] %v4199_v24 }
 0x419   :  { %v4226_v8 = vpop.permute.xlu0 %1314 }
 0x41a   :  { %5145 = vst [vmem:[#allocation70_spill] sm:$0xff] %v4226_v8  ;;  %v2840_v8 = vadd.f32 -1.0, %v3758_v4 }
 0x41b   :  { %v4203_v12 = vpop.permute.xlu1 %1514 }
 0x41c   :  { %5135 = vst [vmem:[#allocation60_spill] sm:$0xff] %v4203_v12  ;;  %v2836_v12 = vadd.f32 -1.0, %v3740_v62  ;;  %v2838_v62 = vadd.f32 -1.0, %v3746_v1 }
 0x41d   :  { %v4249_v13 = vpop.permute.xlu0 %1329 }
 0x41e   :  { %v811_v34 = vmul.f32 1e+30, %v2836_v12  ;;  %v2846_v12 = vadd.f32 -1.0, %v3794_v14 }
 0x420   :  { %v4207_v45 = vpop.permute.xlu1 %1695 }
 0x421   :  { %5137 = vst [vmem:[#allocation62_spill] sm:$0xff] %v4207_v45  ;;  %v2839_v45 = vadd.f32 -1.0, %v3752_v3  ;;  %v2837_v3 = vadd.f32 -1.0, %v3736_v61  ;;  %v815_v61 = vmul.f32 1e+30, %v2840_v8 }
 0x423   :  { %v4238_v22 = vmul.f32 1e+30, %v2839_v45  ;;  %v4253_v45 = vmul.f32 1e+30, %v2845_v43  ;;  %v812_v14 = vmul.f32 1e+30, %v2837_v3  ;;  %v2077_v3 = vadd.f32 %v4067_v59, %v811_v34 }
 0x424   :  { %v4267_v43 = vmul.f32 1e+30, %v2846_v12 }
 0x425   :  { %v4209_v32 = vpop.permute.xlu1 %1876 }
 0x426   :  { %5138 = vst [vmem:[#allocation63_spill] sm:$0xff] %v4209_v32  ;;  %v2841_v32 = vadd.f32 -1.0, %v3764_v6 }
 0x428   :  { %v4241_v6 = vmul.f32 1e+30, %v2841_v32  ;;  %v813_v32 = vmul.f32 1e+30, %v2838_v62  ;;  %v1715_v62 = vadd.f32 %v4076_v63, %v811_v34 }
 0x42a   :  { %v4213_v28 = vpop.permute.xlu1 %2057  ;;  %v1536_v63 = vadd.f32 %v4119_v37, %v813_v32  ;;  %v1717_v59 = vadd.f32 %v4091_v50, %v813_v32 }
 0x42b   :  { %5140 = vst [vmem:[#allocation65_spill] sm:$0xff] %v4213_v28  ;;  %v2843_v28 = vadd.f32 -1.0, %v3776_v9  ;;  %v2842_v9 = vadd.f32 -1.0, %v3770_v7  ;;  %v2848_v7 = vadd.f32 -1.0, %v3808_v18 }
 0x42c   :  { %v1552_v50 = vsel %vm826_vm7, %v1536_v63, -inf  ;;  %v1538_v63 = vadd.f32 %v4145_v10, %v815_v61  ;;  %v1357_v10 = vadd.f32 %v4123_v42, %v815_v61 }
 0x42d   :  { %v4281_v12 = vmul.f32 1e+30, %v2848_v7  ;;  %v2093_v7 = vsel %vm826_vm7, %v2077_v3, -inf  ;;  %v1716_v3 = vadd.f32 %v4107_v48, %v812_v14 }
 0x42f   :  { %v4217_v23 = vpop.permute.xlu1 %1324 }
 0x430   :  { %5142 = vst [vmem:[#allocation67_spill] sm:$0xff] %v4217_v23  ;;  %v2847_v23 = vadd.f32 -1.0, %v3799_v16  ;;  %v2844_v16 = vadd.f32 -1.0, %v3782_v11  ;;  %v4259_v11 = vmul.f32 1e+30, %v2849_v41 }
 0x432   :  { %v4251_v1 = vmul.f32 1e+30, %v2847_v23  ;;  %v1534_v23 = vadd.f32 %v4053_v54, %v811_v34  ;;  %v1355_v54 = vadd.f32 %v4083_v35, %v813_v32 }
 0x434   :  { %v4221_v24 = vpop.permute.xlu1 %1510  ;;  %5147 = vst [vmem:[#allocation72_spill] sm:$0xff] %v4251_v1  ;;  %v4265_v1 = vmul.f32 1e+30, %v2844_v16 }
 0x435   :  { %5144 = vst [vmem:[#allocation69_spill] sm:$0xff] %v4221_v24  ;;  %v810_v24 = vmul.f32 1e+30, %v2835_v36 }
 0x437   :  { %v1352_v36 = vadd.f32 %v4087_v5, %v810_v24  ;;  %v1533_v19 = vadd.f32 %v4096_v38, %v810_v24  ;;  %v4261_v5 = vmul.f32 1e+30, %v2842_v9  ;;  %v1353_v38 = vadd.f32 %v4047_v53, %v811_v34 }
 0x438   :  { %v1895_v9 = vadd.f32 %v4104_v27, %v810_v24  ;;  %v1714_v8 = vadd.f32 %v4073_v60, %v810_v24  ;;  %v2076_v53 = vadd.f32 %v4111_v15, %v810_v24  ;;  %v1550_v27 = vsel %vm826_vm7, %v1534_v23, -inf }
 0x439   :  { %v4230_v46 = vpop.permute.xlu1 %1691  ;;  %v1368_v18 = vsel %vm826_vm7, %v1352_v36, -inf  ;;  %v1549_v41 = vsel %vm826_vm7, %v1533_v19, -inf  ;;  %v4283_v36 = vpop.permute.xlu0 %1339  ;;  %v1369_v19 = vsel %vm826_vm7, %v1353_v38, -inf  ;;  %v1898_v15 = vadd.f32 %v4126_v57, %v813_v32 }
 0x43a   :  { %5146 = vst [vmem:[#allocation71_spill] sm:$0xff] %v4230_v46  ;;  %v4244_v46 = vmul.f32 1e+30, %v2843_v28  ;;  %v2850_v28 = vadd.f32 -1.0, %v3819_v20  ;;  %v1896_v20 = vadd.f32 %v4061_v58, %v811_v34  ;;  %v1731_v24 = vsel %vm826_vm7, %v1715_v62, -inf }
 0x43b   :  { %v1375_v60 = vmax.f32 %v1369_v19, %v1368_v18  ;;  %v1556_v37 = vmax.f32 %v1550_v27, %v1549_v41  ;;  %v1911_v34 = vsel %vm826_vm7, %v1895_v9, -inf  ;;  %v2092_v38 = vsel %vm826_vm7, %v2076_v53, -inf }
 0x43c   :  { %v4285_v58 = vmul.f32 1e+30, %v2850_v28  ;;  %v1912_v35 = vsel %vm826_vm7, %v1896_v20, -inf  ;;  %v1730_v28 = vsel %vm826_vm7, %v1714_v8, -inf  ;;  %v1371_v23 = vsel %vm826_vm7, %v1355_v54, -inf }
 0x43d   :  { %v1535_v57 = vadd.f32 %v4099_v0, %v812_v14  ;;  %v2079_v62 = vadd.f32 %v4133_v26, %v813_v32  ;;  %v1733_v20 = vsel %vm826_vm7, %v1717_v59, -inf  ;;  %v1914_v41 = vsel %vm826_vm7, %v1898_v15, -inf  ;;  %v4309_v19 = vpop.permute.xlu0 %2065 }
 0x43e   :  { %v4255_v4 = vpop.permute.xlu1 %1872  ;;  %v1354_v9 = vadd.f32 %v4139_v33, %v812_v14  ;;  %v1918_v8 = vmax.f32 %v1912_v35, %v1911_v34  ;;  %v1737_v53 = vmax.f32 %v1731_v24, %v1730_v28  ;;  %v1897_v54 = vadd.f32 %v4113_v40, %v812_v14 }
 0x43f   :  { %v2099_v0 = vmax.f32 %v2093_v7, %v2092_v38  ;;  %v1373_v26 = vmax.f32 %v1371_v23, %v1375_v60  ;;  %v1554_v32 = vmax.f32 %v1552_v50, %v1556_v37  ;;  %v2078_v27 = vadd.f32 %v4117_v25, %v812_v14 }
 0x440   :  { %v1735_v59 = vmax.f32 %v1733_v20, %v1737_v53  ;;  %v1551_v15 = vsel %vm826_vm7, %v1535_v57, -inf  ;;  %v2095_v48 = vsel %vm826_vm7, %v2079_v62, -inf  ;;  %v1732_v33 = vsel %vm826_vm7, %v1716_v3, -inf }
 0x441   :  { %v1370_v24 = vsel %vm826_vm7, %v1354_v9, -inf  ;;  %v1900_v40 = vadd.f32 %v4153_v30, %v815_v61  ;;  %v1913_v60 = vsel %vm826_vm7, %v1897_v54, -inf  ;;  %v1555_v14 = vsel %vm826_vm7, %v1538_v63, -inf  ;;  %v4331_v57 = vpop.permute.xlu0 %1518 }
 0x442   :  { %v2081_v25 = vadd.f32 %v4162_v56, %v815_v61  ;;  %v1719_v37 = vadd.f32 %v4129_v52, %v815_v61  ;;  %v1560_v7 = vmax.f32 %v1551_v15, %v1554_v32  ;;  %v2094_v34 = vsel %vm826_vm7, %v2078_v27, -inf }
 0x443   :  { %v4277_v16 = vpop.permute.xlu1 %2053  ;;  %v1356_v28 = vadd.f32 %v4169_v39, %v4238_v22  ;;  %v1537_v30 = vadd.f32 %v4135_v17, %v4238_v22  ;;  %v2097_v42 = vmax.f32 %v2095_v48, %v2099_v0  ;;  %v1741_v38 = vmax.f32 %v1732_v33, %v1735_v59 }
 0x444   :  { %5148 = vst [vmem:[#allocation73_spill] sm:$0xff] %v4277_v16  ;;  %v1916_v16 = vmax.f32 %v1914_v41, %v1918_v8  ;;  %v1379_v23 = vmax.f32 %v1370_v24, %v1373_v26  ;;  %v1718_v50 = vadd.f32 %v4175_v2, %v4238_v22  ;;  %v1558_v62 = vmax.f32 %v1555_v14, %v1560_v7  ;;  %v5151_v7 = vld [vmem:[#allocation51_spill] sm:$0xff] }
 0x445   :  { %v1917_v61 = vsel %vm826_vm7, %v1900_v40, -inf  ;;  %v1374_v52 = vsel %vm826_vm7, %v1357_v10, -inf  ;;  %v2103_v20 = vmax.f32 %v2094_v34, %v2097_v42  ;;  %v2098_v39 = vsel %vm826_vm7, %v2081_v25, -inf  ;;  %v5149_v10 = vld [vmem:[#allocation57_spill] sm:$0xff]  ;;  %v5153_v42 = vld [vmem:[#allocation52_spill] sm:$0xff] }
 0x446   :  { %v1922_v56 = vmax.f32 %v1913_v60, %v1916_v16  ;;  %v1736_v41 = vsel %vm826_vm7, %v1719_v37, -inf  ;;  %v1899_v17 = vadd.f32 %v4141_v44, %v4238_v22  ;;  %v1372_v2 = vsel %vm826_vm7, %v1356_v28, -inf  ;;  %v5152_v28 = vld [vmem:[#allocation61_spill] sm:$0xff] }
 0x447   :  { %v1553_v9 = vsel %vm826_vm7, %v1537_v30, -inf  ;;  %v1540_v16 = vadd.f32 %v4181_v31, %v4261_v5  ;;  %v2080_v8 = vadd.f32 %v4147_v55, %v4238_v22  ;;  %v1377_v53 = vmax.f32 %v1374_v52, %v1379_v23  ;;  %v4357_v22 = vpop.permute.xlu0 %1699  ;;  %v5154_v23 = vld [vmem:[#allocation53_spill] sm:$0xff] }
 0x448   :  { %v4301_v18 = vpop.permute.xlu1 %1522  ;;  %v1734_v54 = vsel %vm826_vm7, %v1718_v50, -inf  ;;  %v1902_v63 = vadd.f32 %v4189_v21, %v4261_v5  ;;  %v1359_v44 = vadd.f32 %v4151_v51, %v4261_v5  ;;  %v1920_v0 = vmax.f32 %v1917_v61, %v1922_v56 }
 0x449   :  { %v2101_v26 = vmax.f32 %v2098_v39, %v2103_v20  ;;  %v1739_v32 = vmax.f32 %v1736_v41, %v1741_v38  ;;  %v1721_v27 = vadd.f32 %v4157_v49, %v4261_v5  ;;  %v1383_v59 = vmax.f32 %v1372_v2, %v1377_v53 }
 0x44a   :  { %v1564_v31 = vmax.f32 %v1553_v9, %v1558_v62  ;;  %v1915_v15 = vsel %vm826_vm7, %v1899_v17, -inf  ;;  %v1539_v55 = vadd.f32 %v4165_v47, %v4241_v6  ;;  %v1559_v21 = vsel %vm826_vm7, %v1540_v16, -inf  ;;  %v5150_v47 = vld [vmem:[#allocation59_spill] sm:$0xff]  ;;  %v5155_v17 = vld [vmem:[#allocation70_spill] sm:$0xff] }
 0x44b   :  { %v1745_v48 = vmax.f32 %v1734_v54, %v1739_v32  ;;  %v2096_v51 = vsel %vm826_vm7, %v2080_v8, -inf  ;;  %v2083_v33 = vadd.f32 %v4193_v29, %v4261_v5  ;;  %v1921_v49 = vsel %vm826_vm7, %v1902_v63, -inf  ;;  %v4384_v9 = vpop.permute.xlu0 %1880  ;;  %v5156_v54 = vld [vmem:[#allocation64_spill] sm:$0xff] }
 0x44c   :  { %v1378_v40 = vsel %vm826_vm7, %v1359_v44, -inf  ;;  %v1358_v60 = vadd.f32 %v5149_v10, %v4241_v6  ;;  %v1720_v14 = vadd.f32 %v5150_v47, %v4241_v6  ;;  %v1926_v25 = vmax.f32 %v1915_v15, %v1920_v0  ;;  %v5159_v47 = vld [vmem:[#allocation60_spill] sm:$0xff] }
 0x44d   :  { %v4318_v35 = vpop.permute.xlu1 %1703  ;;  %v1740_v37 = vsel %vm826_vm7, %v1721_v27, -inf  ;;  %v1901_v34 = vadd.f32 %v5151_v7, %v4241_v6  ;;  %v1542_v29 = vadd.f32 %v5152_v28, %v4265_v1  ;;  %v1562_v5 = vmax.f32 %v1559_v21, %v1564_v31 }
 0x44e   :  { %v1557_v30 = vsel %vm826_vm7, %v1539_v55, -inf  ;;  %v2082_v38 = vadd.f32 %v5153_v42, %v4241_v6  ;;  %v1361_v50 = vadd.f32 %v5154_v23, %v4265_v1  ;;  %v2107_v56 = vmax.f32 %v2096_v51, %v2101_v26  ;;  %v5157_v26 = vld [vmem:[#allocation66_spill] sm:$0xff]  ;;  %v5163_v23 = vld [vmem:[#allocation56_spill] sm:$0xff] }
 0x44f   :  { %v1924_v62 = vmax.f32 %v1921_v49, %v1926_v25  ;;  %v1381_v61 = vmax.f32 %v1378_v40, %v1383_v59  ;;  %v2102_v52 = vsel %vm826_vm7, %v2083_v33, -inf  ;;  %v1743_v20 = vmax.f32 %v1740_v37, %v1745_v48  ;;  %v5158_v55 = vld [vmem:[#allocation54_spill] sm:$0xff]  ;;  %v5160_v37 = vld [vmem:[#allocation68_spill] sm:$0xff]  ;;  %v1531_v28 = vpop.permute.xlu0 %1530 }
 0x450   :  { %v1376_v39 = vsel %vm826_vm7, %v1358_v60, -inf  ;;  %v1738_v41 = vsel %vm826_vm7, %v1720_v14, -inf  ;;  %v1360_v2 = vadd.f32 %v5155_v17, %v4244_v46  ;;  %v1568_v6 = vmax.f32 %v1557_v30, %v1562_v5  ;;  %v5162_v30 = vld [vmem:[#allocation55_spill] sm:$0xff] }
 0x451   :  { %v1919_v8 = vsel %vm826_vm7, %v1901_v34, -inf  ;;  %v1563_v53 = vsel %vm826_vm7, %v1542_v29, -inf  ;;  %v1723_v63 = vadd.f32 %v5156_v54, %v4265_v1  ;;  %v2100_v44 = vsel %vm826_vm7, %v2082_v38, -inf  ;;  %v5161_v29 = vld [vmem:[#allocation67_spill] sm:$0xff] }
 0x452   :  { %v4339_v3 = vpop.permute.xlu1 %1884  ;;  %v1382_v0 = vsel %vm826_vm7, %v1361_v50, -inf  ;;  %v1904_v32 = vadd.f32 %v5157_v26, %v4265_v1  ;;  %v1363_v27 = vadd.f32 %v4249_v13, %v4267_v43  ;;  %v2105_v59 = vmax.f32 %v2102_v52, %v2107_v56 }
 0x453   :  { %v1387_v31 = vmax.f32 %v1376_v39, %v1381_v61  ;;  %v1749_v15 = vmax.f32 %v1738_v41, %v1743_v20  ;;  %v1541_v48 = vadd.f32 %v5158_v55, %v4244_v46  ;;  %v1930_v21 = vmax.f32 %v1919_v8, %v1924_v62  ;;  %v5164_v62 = vld [vmem:[#allocation72_spill] sm:$0xff]  ;;  %v5165_v61 = vld [vmem:[#allocation62_spill] sm:$0xff]  ;;  %v5166_v55 = vld [vmem:[#allocation63_spill] sm:$0xff] }
 0x454   :  { %v1570_v51 = vmax.f32 %v1563_v53, %v1568_v6  ;;  %v1380_v33 = vsel %vm826_vm7, %v1360_v2, -inf  ;;  %v1365_v49 = vadd.f32 %v4283_v36, %v4281_v12  ;;  %v2115_v40 = vmax.f32 %v2100_v44, %v2105_v59  ;;  %v1712_v59 = vpop.permute.xlu0 %1711 }
 0x455   :  { %v1744_v10 = vsel %vm826_vm7, %v1723_v63, -inf  ;;  %v1391_v60 = vmax.f32 %v1382_v0, %v1387_v31  ;;  %v1544_v13 = vadd.f32 %v5159_v47, %v4267_v43  ;;  %v1925_v25 = vsel %vm826_vm7, %v1904_v32, -inf }
 0x456   :  { %v2085_v7 = vadd.f32 %v5160_v37, %v4265_v1  ;;  %v1386_v34 = vsel %vm826_vm7, %v1363_v27, -inf  ;;  %v1362_v5 = vadd.f32 %v5161_v29, %v4253_v45  ;;  %v1561_v36 = vsel %vm826_vm7, %v1541_v48, -inf }
 0x457   :  { %v1335_v24 = vpop.permute.xlu1 %1334  ;;  %v1722_v42 = vadd.f32 %v5162_v30, %v4244_v46  ;;  %v1385_v38 = vmax.f32 %v1380_v33, %v1391_v60  ;;  %v1903_v50 = vadd.f32 %v5163_v23, %v4244_v46  ;;  %v1390_v56 = vsel %vm826_vm7, %v1365_v49, -inf  ;;  %v5169_v23 = vld [vmem:[#allocation71_spill] sm:$0xff] }
 0x458   :  { %v1545_v1 = vadd.f32 %v4331_v57, %v5164_v62  ;;  %v1725_v52 = vadd.f32 %v5165_v61, %v4267_v43  ;;  %v1364_v20 = vadd.f32 %v1335_v24, %v5164_v62  ;;  %v1751_v39 = vmax.f32 %v1744_v10, %v1749_v15 }
 0x459   :  { %v1932_v41 = vmax.f32 %v1925_v25, %v1930_v21  ;;  %v1389_v17 = vmax.f32 %v1386_v34, %v1385_v38  ;;  %v1567_v2 = vsel %vm826_vm7, %v1544_v13, -inf  ;;  %v1576_v6 = vmax.f32 %v1561_v36, %v1570_v51  ;;  %v5167_v51 = vld [vmem:[#allocation69_spill] sm:$0xff]  ;;  %v5168_v13 = vld [vmem:[#allocation58_spill] sm:$0xff] }
 0x45a   :  { %v2106_v8 = vsel %vm826_vm7, %v2085_v7, -inf  ;;  %v1384_v53 = vsel %vm826_vm7, %v1362_v5, -inf  ;;  %v1742_v57 = vsel %vm826_vm7, %v1722_v42, -inf  ;;  %v1923_v44 = vsel %vm826_vm7, %v1903_v50, -inf }
 0x45b   :  { %v1396_v0 = vmax.f32 %v1389_v17, %v1390_v56  ;;  %v1548_v24 = vadd.f32 %v1531_v28, %v4285_v58  ;;  %v1566_v26 = vmax.f32 %v1567_v2, %v1576_v6  ;;  %v1569_v32 = vsel %vm826_vm7, %v1545_v1, -inf }
 0x45c   :  { %v4386_v16 = vpop.permute.xlu1 %2061  ;;  %v1748_v27 = vsel %vm826_vm7, %v1725_v52, -inf  ;;  %v1388_v31 = vsel %vm826_vm7, %v1364_v20, -inf  ;;  %v1726_v15 = vadd.f32 %v4357_v22, %v5164_v62  ;;  %v1906_v48 = vadd.f32 %v5166_v55, %v4267_v43 }
 0x45d   :  { %v1395_v21 = vmax.f32 %v1384_v53, %v1396_v0  ;;  %v1543_v33 = vadd.f32 %v5167_v51, %v4253_v45  ;;  %v4441_v49 = vmax.f32 %v2106_v8, %v2115_v40  ;;  %v1757_v10 = vmax.f32 %v1742_v57, %v1751_v39 }
 0x45e   :  { %v1938_v60 = vmax.f32 %v1923_v44, %v1932_v41  ;;  %v1575_v25 = vsel %vm826_vm7, %v1548_v24, -inf  ;;  %v1546_v22 = vadd.f32 %v4301_v18, %v4281_v12  ;;  %v1572_v34 = vmax.f32 %v1569_v32, %v1566_v26  ;;  %v1893_v18 = vpop.permute.xlu0 %1892 }
 0x45f   :  { %v1393_v37 = vmax.f32 %v1388_v31, %v1395_v21  ;;  %v1747_v28 = vmax.f32 %v1748_v27, %v1757_v10  ;;  %v1729_v29 = vadd.f32 %v1712_v59, %v4285_v58  ;;  %v1750_v5 = vsel %vm826_vm7, %v1726_v15, -inf }
 0x460   :  { %v1929_v36 = vsel %vm826_vm7, %v1906_v48, -inf  ;;  %v1565_v30 = vsel %vm826_vm7, %v1543_v33, -inf  ;;  %v1907_v42 = vadd.f32 %v4384_v9, %v5164_v62  ;;  %v1577_v38 = vmax.f32 %v1575_v25, %v1572_v34 }
 0x461   :  { %v1350_v14 = vpop.permute.xlu1 %1349  ;;  %v1724_v50 = vadd.f32 %v5169_v23, %v4253_v45  ;;  %v2089_v61 = vadd.f32 %v4309_v19, %v4281_v12  ;;  %v1571_v52 = vsel %vm826_vm7, %v1546_v22, -inf  ;;  %v1753_v39 = vmax.f32 %v1750_v5, %v1747_v28  ;;  %v5170_v19 = vld [vmem:[#allocation65_spill] sm:$0xff] }
 0x462   :  { %v1367_v54 = vadd.f32 %v1350_v14, %v4285_v58  ;;  %v2084_v14 = vadd.f32 %v5168_v13, %v4244_v46  ;;  %v1756_v41 = vsel %vm826_vm7, %v1729_v29, -inf  ;;  %v1574_v17 = vmax.f32 %v1565_v30, %v1577_v38 }
 0x463   :  { %v1727_v9 = vadd.f32 %v4318_v35, %v4281_v12  ;;  %v1928_v6 = vmax.f32 %v1929_v36, %v1938_v60  ;;  %v1910_v8 = vadd.f32 %v1893_v18, %v4285_v58  ;;  %v1931_v57 = vsel %vm826_vm7, %v1907_v42, -inf }
 0x464   :  { %v1394_v47 = vsel %vm826_vm7, %v1367_v54, -inf  ;;  %v2104_v1 = vsel %vm826_vm7, %v2084_v14, -inf  ;;  %v2087_v44 = vadd.f32 %v5170_v19, %v4267_v43  ;;  %v1746_v0 = vsel %vm826_vm7, %v1724_v50, -inf }
 0x465   :  { %v1397_v46 = vmax.f32 %v1393_v37, %v1394_v47  ;;  %v1578_v24 = vmax.f32 %v1574_v17, %v1571_v52  ;;  %v1758_v26 = vmax.f32 %v1756_v41, %v1753_v39  ;;  %v1905_v32 = vadd.f32 %v4255_v4, %v4253_v45  ;;  %v5171_v4 = vld [vmem:[#allocation73_spill] sm:$0xff]  ;;  %v5172_v52 = vld [vmem:[#allocation3_spill] sm:$0xff] }
 0x466   :  { %v4427_v63 = vpop.permute.xlu1 %2073  ;;  %v2109_v59 = vmax.f32 %v2104_v1, %v4441_v49  ;;  %v2114_v31 = vsel %vm826_vm7, %v2089_v61, -inf  ;;  %v1752_v15 = vsel %vm826_vm7, %v1727_v9, -inf  ;;  %v1937_v48 = vsel %vm826_vm7, %v1910_v8, -inf }
 0x467   :  { %v1755_v43 = vmax.f32 %v1746_v0, %v1758_v26  ;;  %v1908_v21 = vadd.f32 %v4339_v3, %v4281_v12  ;;  %v1934_v10 = vmax.f32 %v1931_v57, %v1928_v6  ;;  %v2086_v60 = vadd.f32 %v5171_v4, %v4253_v45  ;;  %v5173_v6 = vld [vmem:[#allocation5_spill] sm:$0xff] }
 0x468   :  { %v2110_v13 = vsel %vm826_vm7, %v2087_v44, -inf  ;;  %v1927_v14 = vsel %vm826_vm7, %v1905_v32, -inf  ;;  %v2113_v34 = vmax.f32 %v2114_v31, %v2109_v59  ;;  %v2091_v36 = vadd.f32 %v4427_v63, %v4285_v58 }
 0x469   :  { %v1759_v25 = vmax.f32 %v1755_v43, %v1752_v15  ;;  %v1939_v37 = vmax.f32 %v1937_v48, %v1934_v10  ;;  %v1933_v28 = vsel %vm826_vm7, %v1908_v21, -inf  ;;  %v2108_v5 = vsel %vm826_vm7, %v2086_v60, -inf }
 0x46a   :  { %v2120_v42 = vmax.f32 %v2113_v34, %v2110_v13  ;;  %v2118_v58 = vsel %vm826_vm7, %v2091_v36, -inf }
 0x46b   :  { %v1345_v7 = vpop.permute.xlu1 %1344 }
 0x46c   :  { %v1366_v40 = vadd.f32 %v1345_v7, %v4259_v11  ;;  %v2088_v7 = vadd.f32 %v4386_v16, %v5164_v62 }
 0x46e   :  { %v1392_v56 = vsel %vm826_vm7, %v1366_v40, -inf  ;;  %v1936_v40 = vmax.f32 %v1927_v14, %v1939_v37  ;;  %v2112_v23 = vsel %vm826_vm7, %v2088_v7, -inf }
 0x46f   :  { %v1398_v20 = vmax.f32 %v1392_v56, %v1397_v46  ;;  %v2119_v56 = vmax.f32 %v2108_v5, %v2120_v42 }
 0x470   :  { %v1527_v2 = vpop.permute.xlu1 %1526  ;;  %v1940_v18 = vmax.f32 %v1936_v40, %v1933_v28 }
 0x471   :  { %v1399_v53 = vrot.slane %v1398_v20, 4  ;;  %v1547_v54 = vadd.f32 %v1527_v2, %v4259_v11  ;;  %v2117_v41 = vmax.f32 %v2112_v23, %v2119_v56 }
 0x473   :  { %v1400_v35 = vmax.f32 %v1398_v20, %v1399_v53  ;;  %v1573_v27 = vsel %vm826_vm7, %v1547_v54, -inf  ;;  %v2121_v19 = vmax.f32 %v2117_v41, %v2118_v58 }
 0x474   :  { %v1579_v55 = vmax.f32 %v1573_v27, %v1578_v24 }
 0x475   :  { %v1401_v51 = vrot.slane %v1400_v35, 2  ;;  %v1708_v33 = vpop.permute.xlu1 %1707 }
 0x476   :  { %v1580_v47 = vrot.slane %v1579_v55, 4  ;;  %v1728_v49 = vadd.f32 %v1708_v33, %v4259_v11 }
 0x477   :  { %v1402_v22 = vmax.f32 %v1400_v35, %v1401_v51 }
 0x478   :  { %v1581_v12 = vmax.f32 %v1579_v55, %v1580_v47  ;;  %v1754_v3 = vsel %vm826_vm7, %v1728_v49, -inf }
 0x479   :  { %v1403_v45 = vrot.slane %v1402_v22, 1  ;;  %v1760_v29 = vmax.f32 %v1754_v3, %v1759_v25  ;;  %v5174_v3 = vld [vmem:[#allocation4_spill] sm:$0xff] }
 0x47a   :  { %v1582_v30 = vrot.slane %v1581_v12, 2  ;;  %v1889_v46 = vpop.permute.xlu1 %1888 }
 0x47b   :  { %v4493_v38 = vmax.f32 %v1402_v22, %v1403_v45  ;;  %v1761_v16 = vrot.slane %v1760_v29, 4  ;;  %v1909_v62 = vadd.f32 %v1889_v46, %v4259_v11  ;;  %v5175_v46 = vld [vmem:[#allocation6_spill] sm:$0xff] }
 0x47c   :  { %v1583_v50 = vmax.f32 %v1581_v12, %v1582_v30 }
 0x47d   :  { %v1762_v1 = vmax.f32 %v1760_v29, %v1761_v16  ;;  %v1935_v61 = vsel %vm826_vm7, %v1909_v62, -inf  ;;  %v1405_v20 = vmul.f32 %v5172_v52, %v4493_v38  ;;  %v1406_v8 = vmul.f32 %v5173_v6, %v4493_v38 }
 0x47e   :  { %v1584_v63 = vrot.slane %v1583_v50, 1  ;;  %v1941_v39 = vmax.f32 %v1935_v61, %v1940_v18  ;;  %v1407_v34 = vmul.f32 %v5174_v3, %v4493_v38  ;;  %v1408_v16 = vmul.f32 %v5175_v46, %v4493_v38 }
 0x47f   :  { %v1763_v17 = vrot.slane %v1762_v1, 2  ;;  %v2070_v9 = vpop.permute.xlu1 %2069  ;;  %v1421_v2 = vsel %vm826_vm7, %v1405_v20, 0.0  ;;  %v1424_v27 = vsel %vm826_vm7, %v1406_v8, 0.0 }
 0x480   :  { %v4504_v53 = vmax.f32 %v1583_v50, %v1584_v63  ;;  %v1942_v54 = vrot.slane %v1941_v39, 4  ;;  %v2090_v57 = vadd.f32 %v2070_v9, %v4259_v11  ;;  %1422 = vadd.xlane.f32.xlu0 %v1421_v2  ;;  %v1427_v45 = vsel %vm826_vm7, %v1407_v34, 0.0  ;;  %v5176_v63 = vld [vmem:[#allocation7_spill] sm:$0xff] }
 0x481   :  { %v1764_v44 = vmax.f32 %v1762_v1, %v1763_v17  ;;  %v1430_v18 = vsel %vm826_vm7, %v1408_v16, 0.0 }
 0x482   :  { %v1943_v0 = vmax.f32 %v1941_v39, %v1942_v54  ;;  %v2116_v24 = vsel %vm826_vm7, %v2090_v57, -inf  ;;  %v1586_v26 = vmul.f32 %v5172_v52, %v4504_v53  ;;  %v1587_v59 = vmul.f32 %v5173_v6, %v4504_v53  ;;  %v5177_v57 = vld [vmem:[#allocation8_spill] sm:$0xff] }
 0x483   :  { %v1765_v32 = vrot.slane %v1764_v44, 1  ;;  %v2122_v35 = vmax.f32 %v2116_v24, %v2121_v19  ;;  %v1588_v5 = vmul.f32 %v5174_v3, %v4504_v53  ;;  %v1589_v42 = vmul.f32 %v5175_v46, %v4504_v53 }
 0x484   :  { %v1944_v31 = vrot.slane %v1943_v0, 2  ;;  %1425 = vadd.xlane.f32.xlu0 %v1424_v27  ;;  %v1602_v11 = vsel %vm826_vm7, %v1586_v26, 0.0  ;;  %v1605_v21 = vsel %vm826_vm7, %v1587_v59, 0.0  ;;  %v1409_v39 = vmul.f32 %v5176_v63, %v4493_v38 }
 0x485   :  { %v4514_v15 = vmax.f32 %v1764_v44, %v1765_v32  ;;  %v2123_v55 = vrot.slane %v2122_v35, 4  ;;  %1603 = vadd.xlane.f32.xlu1 %v1602_v11  ;;  %v1608_v30 = vsel %vm826_vm7, %v1588_v5, 0.0  ;;  %v1611_v62 = vsel %vm826_vm7, %v1589_v42, 0.0 }
 0x486   :  { %v1945_v48 = vmax.f32 %v1943_v0, %v1944_v31  ;;  %v1433_v17 = vsel %vm826_vm7, %v1409_v39, 0.0  ;;  %v1591_v19 = vmul.f32 %v5177_v57, %v4504_v53  ;;  %v1410_v44 = vmul.f32 %v5177_v57, %v4493_v38 }
 0x487   :  { %v2124_v43 = vmax.f32 %v2122_v35, %v2123_v55  ;;  %v1767_v51 = vmul.f32 %v5172_v52, %v4514_v15  ;;  %v1768_v33 = vmul.f32 %v5173_v6, %v4514_v15  ;;  %v1770_v23 = vmul.f32 %v5175_v46, %v4514_v15 }
 0x488   :  { %v1946_v10 = vrot.slane %v1945_v48, 1  ;;  %1606 = vadd.xlane.f32.xlu0 %v1605_v21  ;;  %v1769_v50 = vmul.f32 %v5174_v3, %v4514_v15  ;;  %v1617_v0 = vsel %vm826_vm7, %v1591_v19, 0.0  ;;  %v1436_v24 = vsel %vm826_vm7, %v1410_v44, 0.0 }
 0x489   :  { %v2125_v4 = vrot.slane %v2124_v43, 2  ;;  %v1783_v60 = vsel %vm826_vm7, %v1767_v51, 0.0  ;;  %v1786_v13 = vsel %vm826_vm7, %v1768_v33, 0.0  ;;  %v1792_v56 = vsel %vm826_vm7, %v1770_v23, 0.0  ;;  %v4600_v51 = vld [vmem:[%s4988_s13] sm:$0x1f] }
 0x48a   :  { %v4522_v47 = vmax.f32 %v1945_v48, %v1946_v10  ;;  %1784 = vadd.xlane.f32.xlu1 %v1783_v60  ;;  %v1789_v1 = vsel %vm826_vm7, %v1769_v50, 0.0  ;;  %v1772_v26 = vmul.f32 %v5177_v57, %v4514_v15  ;;  %v1771_v32 = vmul.f32 %v5176_v63, %v4514_v15  ;;  %v5178_v48 = vld [vmem:[#allocation9_spill] sm:$0xff]  ;;  %3192 = vmatprep.subr.msk.mxu1 %vm2375_vm11, %v4600_v51 }
 0x48b   :  { %v2126_v49 = vmax.f32 %v2124_v43, %v2125_v4  ;;  %v1411_v43 = vmul.f32 %v5178_v48, %v4493_v38  ;;  %v1592_v60 = vmul.f32 %v5178_v48, %v4504_v53  ;;  %3193 = vmatpush3.msk.msra.mxu1 %vm2375_vm11, %v4600_v51 }
 0x48c   :  { %1787 = vadd.xlane.f32.xlu0 %v1786_v13  ;;  %v1948_v14 = vmul.f32 %v5172_v52, %v4522_v47  ;;  %v1949_v25 = vmul.f32 %v5173_v6, %v4522_v47  ;;  %v1951_v61 = vmul.f32 %v5175_v46, %v4522_v47  ;;  %v1798_v35 = vsel %vm826_vm7, %v1772_v26, 0.0  ;;  %v5184_v26 = vld [vmem:[#allocation13_spill] sm:$0xff] }
 0x48d   :  { %v2127_v22 = vrot.slane %v2126_v49, 1  ;;  %v1795_v27 = vsel %vm826_vm7, %v1771_v32, 0.0  ;;  %v1953_v59 = vmul.f32 %v5177_v57, %v4522_v47  ;;  %v1952_v31 = vmul.f32 %v5176_v63, %v4522_v47 }
 0x48e   :  { %v1964_v37 = vsel %vm826_vm7, %v1948_v14, 0.0  ;;  %v1967_v7 = vsel %vm826_vm7, %v1949_v25, 0.0  ;;  %v1973_v20 = vsel %vm826_vm7, %v1951_v61, 0.0  ;;  %v1439_v33 = vsel %vm826_vm7, %v1411_v43, 0.0  ;;  %v5180_v25 = vld [vmem:[#allocation10_spill] sm:$0xff]  ;;  %v5182_v61 = vld [vmem:[#allocation12_spill] sm:$0xff] }
 0x48f   :  { %v4531_v12 = vmax.f32 %v2126_v49, %v2127_v22  ;;  %1965 = vadd.xlane.f32.xlu1 %v1964_v37  ;;  %v1979_v11 = vsel %vm826_vm7, %v1953_v59, 0.0  ;;  %v1976_v55 = vsel %vm826_vm7, %v1952_v31, 0.0  ;;  %v5179_v49 = vmov 0.0   ;;  %v5185_v43 = vld [vmem:[#allocation14_spill] sm:$0xff] }
 0x490   :  { %1968 = vadd.xlane.f32.xlu0 %v1967_v7  ;;  %3253 = vmatprep.subr.mxu1 %v5179_v49  ;;  %v1620_v14 = vsel %vm826_vm7, %v1592_v60, 0.0  ;;  %v1593_v22 = vmul.f32 %v5180_v25, %v4504_v53  ;;  %v1412_v37 = vmul.f32 %v5180_v25, %v4493_v38  ;;  %v1774_v34 = vmul.f32 %v5180_v25, %v4514_v15 }
 0x491   :  { %v2129_v28 = vmul.f32 %v5172_v52, %v4531_v12  ;;  %v2130_v40 = vmul.f32 %v5173_v6, %v4531_v12  ;;  %v1950_v52 = vmul.f32 %v5174_v3, %v4522_v47  ;;  %v2131_v41 = vmul.f32 %v5174_v3, %v4531_v12 }
 0x492   :  { %v2132_v2 = vmul.f32 %v5175_v46, %v4531_v12  ;;  %v1590_v6 = vmul.f32 %v5176_v63, %v4504_v53  ;;  %v2133_v21 = vmul.f32 %v5176_v63, %v4531_v12  ;;  %v2134_v4 = vmul.f32 %v5177_v57, %v4531_v12  ;;  %v5181_v46 = vld [vmem:[#allocation11_spill] sm:$0xff] }
 0x493   :  { %v2145_v29 = vsel %vm826_vm7, %v2129_v28, 0.0  ;;  %v2148_v36 = vsel %vm826_vm7, %v2130_v40, 0.0  ;;  %v1970_v58 = vsel %vm826_vm7, %v1950_v52, 0.0  ;;  %v2151_v9 = vsel %vm826_vm7, %v2131_v41, 0.0 }
 0x494   :  { %1428 = vadd.xlane.f32.xlu0 %v1427_v45  ;;  %2146 = vadd.xlane.f32.xlu1 %v2145_v29  ;;  %v2154_v8 = vsel %vm826_vm7, %v2132_v2, 0.0  ;;  %v1614_v54 = vsel %vm826_vm7, %v1590_v6, 0.0  ;;  %v2157_v10 = vsel %vm826_vm7, %v2133_v21, 0.0  ;;  %v2160_v13 = vsel %vm826_vm7, %v2134_v4, 0.0  ;;  %v5183_v2 = vld [vmem:[#allocation18_spill] sm:$0xff] }
 0x495   :  { %v1623_v7 = vsel %vm826_vm7, %v1593_v22, 0.0  ;;  %v1442_v3 = vsel %vm826_vm7, %v1412_v37, 0.0  ;;  %v1773_v28 = vmul.f32 %v5178_v48, %v4514_v15  ;;  %v1804_v45 = vsel %vm826_vm7, %v1774_v34, 0.0 }
 0x496   :  { %v1955_v40 = vmul.f32 %v5180_v25, %v4522_v47  ;;  %v1954_v5 = vmul.f32 %v5178_v48, %v4522_v47  ;;  %v1413_v42 = vmul.f32 %v5181_v46, %v4493_v38  ;;  %v2135_v16 = vmul.f32 %v5178_v48, %v4531_v12 }
 0x497   :  { %v1801_v29 = vsel %vm826_vm7, %v1773_v28, 0.0  ;;  %v2136_v23 = vmul.f32 %v5180_v25, %v4531_v12  ;;  %v1594_v50 = vmul.f32 %v5181_v46, %v4504_v53  ;;  %v1595_v52 = vmul.f32 %v5182_v61, %v4504_v53 }
 0x498   :  { %2149 = vadd.xlane.f32.xlu0 %v2148_v36  ;;  %1609 = vadd.xlane.f32.xlu1 %v1608_v30  ;;  %v1985_v36 = vsel %vm826_vm7, %v1955_v40, 0.0  ;;  %v1982_v30 = vsel %vm826_vm7, %v1954_v5, 0.0  ;;  %v1776_v39 = vmul.f32 %v5182_v61, %v4514_v15  ;;  %v1775_v41 = vmul.f32 %v5181_v46, %v4514_v15 }
 0x499   :  { %v1420_v6 = vmul.f32 %v5183_v2, %v4493_v38  ;;  %v1957_v19 = vmul.f32 %v5182_v61, %v4522_v47  ;;  %v1601_v44 = vmul.f32 %v5183_v2, %v4504_v53  ;;  %v1415_v32 = vmul.f32 %v5184_v26, %v4493_v38 }
 0x49a   :  { %v1782_v31 = vmul.f32 %v5183_v2, %v4514_v15  ;;  %v1416_v21 = vmul.f32 %v5185_v43, %v4493_v38  ;;  %v1597_v60 = vmul.f32 %v5185_v43, %v4504_v53  ;;  %v1777_v37 = vmul.f32 %v5184_v26, %v4514_v15 }
 0x49b   :  { %v1778_v28 = vmul.f32 %v5185_v43, %v4514_v15  ;;  %v1958_v5 = vmul.f32 %v5184_v26, %v4522_v47 }
 0x49c   :  { %1612 = vadd.xlane.f32.xlu0 %v1611_v62  ;;  %1431 = vadd.xlane.f32.xlu1 %v1430_v18  ;;  %v1445_v62 = vsel %vm826_vm7, %v1413_v42, 0.0  ;;  %v2163_v18 = vsel %vm826_vm7, %v2135_v16, 0.0  ;;  %v1635_v25 = vsel %vm826_vm7, %v1597_v60, 0.0  ;;  %v5187_v42 = vld [vmem:[#allocation16_spill] sm:$0xff] }
 0x49d   :  { %v1418_v16 = vmul.f32 %v5187_v42, %v4493_v38 }
 0x4a0   :  { %1793 = vadd.xlane.f32.xlu0 %v1792_v56  ;;  %1790 = vadd.xlane.f32.xlu1 %v1789_v1  ;;  %v2166_v56 = vsel %vm826_vm7, %v2136_v23, 0.0  ;;  %v1626_v1 = vsel %vm826_vm7, %v1594_v50, 0.0  ;;  %v1959_v50 = vmul.f32 %v5185_v43, %v4522_v47 }
 0x4a4   :  { %1974 = vadd.xlane.f32.xlu0 %v1973_v20  ;;  %1971 = vadd.xlane.f32.xlu1 %v1970_v58  ;;  %v1414_v20 = vmul.f32 %v5182_v61, %v4493_v38  ;;  %v1629_v58 = vsel %vm826_vm7, %v1595_v52, 0.0  ;;  %v2139_v52 = vmul.f32 %v5184_v26, %v4531_v12 }
 0x4a6   :  { %v1448_v63 = vsel %vm826_vm7, %v1414_v20, 0.0 }
 0x4a8   :  { %1434 = vadd.xlane.f32.xlu0 %v1433_v17  ;;  %2152 = vadd.xlane.f32.xlu1 %v2151_v9  ;;  %v1810_v17 = vsel %vm826_vm7, %v1776_v39, 0.0  ;;  %v1807_v9 = vsel %vm826_vm7, %v1775_v41, 0.0  ;;  %v5188_v41 = vld [vmem:[#allocation15_spill] sm:$0xff] }
 0x4ac   :  { %2155 = vadd.xlane.f32.xlu0 %v2154_v8  ;;  %1615 = vadd.xlane.f32.xlu1 %v1614_v54  ;;  %v1956_v8 = vmul.f32 %v5181_v46, %v4522_v47  ;;  %v1466_v54 = vsel %vm826_vm7, %v1420_v6, 0.0 }
 0x4ae   :  { %v1988_v57 = vsel %vm826_vm7, %v1956_v8, 0.0 }
 0x4b0   :  { %1618 = vadd.xlane.f32.xlu0 %v1617_v0  ;;  %1437 = vadd.xlane.f32.xlu1 %v1436_v24  ;;  %v1991_v0 = vsel %vm826_vm7, %v1957_v19, 0.0  ;;  %v1647_v24 = vsel %vm826_vm7, %v1601_v44, 0.0  ;;  %v1780_v19 = vmul.f32 %v5187_v42, %v4514_v15 }
 0x4b4   :  { %1799 = vadd.xlane.f32.xlu0 %v1798_v35  ;;  %1796 = vadd.xlane.f32.xlu1 %v1795_v27  ;;  %v2137_v35 = vmul.f32 %v5181_v46, %v4531_v12  ;;  %v1451_v27 = vsel %vm826_vm7, %v1415_v32, 0.0 }
 0x4b6   :  { %v2169_v59 = vsel %vm826_vm7, %v2137_v35, 0.0 }
 0x4b8   :  { %1980 = vadd.xlane.f32.xlu0 %v1979_v11  ;;  %1977 = vadd.xlane.f32.xlu1 %v1976_v55  ;;  %v1596_v11 = vmul.f32 %v5184_v26, %v4504_v53  ;;  %v1828_v55 = vsel %vm826_vm7, %v1782_v31, 0.0  ;;  %v1961_v31 = vmul.f32 %v5187_v42, %v4522_v47 }
 0x4ba   :  { %v1632_v48 = vsel %vm826_vm7, %v1596_v11, 0.0 }
 0x4bc   :  { %1440 = vadd.xlane.f32.xlu0 %v1439_v33  ;;  %2158 = vadd.xlane.f32.xlu1 %v2157_v10  ;;  %v2138_v33 = vmul.f32 %v5182_v61, %v4531_v12  ;;  %v1454_v10 = vsel %vm826_vm7, %v1416_v21, 0.0  ;;  %v2003_v21 = vsel %vm826_vm7, %v1961_v31, 0.0 }
 0x4be   :  { %v2172_v4 = vsel %vm826_vm7, %v2138_v33, 0.0 }
 0x4c0   :  { %2161 = vadd.xlane.f32.xlu0 %v2160_v13  ;;  %1621 = vadd.xlane.f32.xlu1 %v1620_v14  ;;  %v5186_v13 = vld [vmem:[#allocation17_spill] sm:$0xff] }
 0x4c1   :  { %v1419_v14 = vmul.f32 %v5186_v13, %v4493_v38  ;;  %v1962_v20 = vmul.f32 %v5186_v13, %v4522_v47  ;;  %v2143_v26 = vmul.f32 %v5186_v13, %v4531_v12 }
 0x4c3   :  { %v1463_v22 = vsel %vm826_vm7, %v1419_v14, 0.0  ;;  %v2006_v39 = vsel %vm826_vm7, %v1962_v20, 0.0 }
 0x4c4   :  { %1624 = vadd.xlane.f32.xlu0 %v1623_v7  ;;  %1443 = vadd.xlane.f32.xlu1 %v1442_v3  ;;  %v1600_v7 = vmul.f32 %v5186_v13, %v4504_v53  ;;  %v1813_v3 = vsel %vm826_vm7, %v1777_v37, 0.0 }
 0x4c6   :  { %v1644_v34 = vsel %vm826_vm7, %v1600_v7, 0.0 }
 0x4c8   :  { %1805 = vadd.xlane.f32.xlu0 %v1804_v45  ;;  %1802 = vadd.xlane.f32.xlu1 %v1801_v29  ;;  %v1963_v45 = vmul.f32 %v5183_v2, %v4522_v47  ;;  %v1816_v29 = vsel %vm826_vm7, %v1778_v28, 0.0 }
 0x4ca   :  { %v2009_v40 = vsel %vm826_vm7, %v1963_v45, 0.0 }
 0x4cc   :  { %1986 = vadd.xlane.f32.xlu0 %v1985_v36  ;;  %1983 = vadd.xlane.f32.xlu1 %v1982_v30  ;;  %v1781_v36 = vmul.f32 %v5186_v13, %v4514_v15  ;;  %v1994_v30 = vsel %vm826_vm7, %v1958_v5, 0.0  ;;  %v5190_v5 = vld [vmem:[#allocation35_spill] sm:$0xff] }
 0x4ce   :  { %v1825_v46 = vsel %vm826_vm7, %v1781_v36, 0.0 }
 0x4d0   :  { %1446 = vadd.xlane.f32.xlu0 %v1445_v62  ;;  %2164 = vadd.xlane.f32.xlu1 %v2163_v18  ;;  %v2144_v62 = vmul.f32 %v5183_v2, %v4531_v12  ;;  %v1460_v18 = vsel %vm826_vm7, %v1418_v16, 0.0 }
 0x4d2   :  { %v2190_v23 = vsel %vm826_vm7, %v2144_v62, 0.0 }
 0x4d4   :  { %2167 = vadd.xlane.f32.xlu0 %v2166_v56  ;;  %1627 = vadd.xlane.f32.xlu1 %v1626_v1  ;;  %v1599_v56 = vmul.f32 %v5187_v42, %v4504_v53  ;;  %v1997_v1 = vsel %vm826_vm7, %v1959_v50, 0.0 }
 0x4d6   :  { %v1641_v61 = vsel %vm826_vm7, %v1599_v56, 0.0 }
 0x4d8   :  { %1630 = vadd.xlane.f32.xlu0 %v1629_v58  ;;  %1449 = vadd.xlane.f32.xlu1 %v1448_v63  ;;  %v2175_v63 = vsel %vm826_vm7, %v2139_v52, 0.0 }
 0x4dc   :  { %1811 = vadd.xlane.f32.xlu0 %v1810_v17  ;;  %1808 = vadd.xlane.f32.xlu1 %v1807_v9  ;;  %v1598_v17 = vmul.f32 %v5188_v41, %v4504_v53  ;;  %v1417_v9 = vmul.f32 %v5188_v41, %v4493_v38 }
 0x4de   :  { %v1638_v8 = vsel %vm826_vm7, %v1598_v17, 0.0 }
 0x4e0   :  { %1467 = vadd.xlane.f32.xlu0 %v1466_v54  ;;  %1989 = vadd.xlane.f32.xlu1 %v1988_v57  ;;  %v1457_v54 = vsel %vm826_vm7, %v1417_v9, 0.0  ;;  %v2140_v57 = vmul.f32 %v5185_v43, %v4531_v12 }
 0x4e2   :  { %v2178_v38 = vsel %vm826_vm7, %v2140_v57, 0.0 }
 0x4e4   :  { %1992 = vadd.xlane.f32.xlu0 %v1991_v0  ;;  %1648 = vadd.xlane.f32.xlu1 %v1647_v24  ;;  %v1822_v0 = vsel %vm826_vm7, %v1780_v19, 0.0  ;;  %v1779_v24 = vmul.f32 %v5188_v41, %v4514_v15 }
 0x4e6   :  { %v1819_v35 = vsel %vm826_vm7, %v1779_v24, 0.0 }
 0x4e8   :  { %1452 = vadd.xlane.f32.xlu0 %v1451_v27  ;;  %2170 = vadd.xlane.f32.xlu1 %v2169_v59  ;;  %v2187_v27 = vsel %vm826_vm7, %v2143_v26, 0.0  ;;  %v1960_v59 = vmul.f32 %v5188_v41, %v4522_v47  ;;  %v2142_v47 = vmul.f32 %v5187_v42, %v4531_v12 }
 0x4ea   :  { %v2000_v43 = vsel %vm826_vm7, %v1960_v59, 0.0  ;;  %v2184_v7 = vsel %vm826_vm7, %v2142_v47, 0.0 }
 0x4ec   :  { %1829 = vadd.xlane.f32.xlu0 %v1828_v55  ;;  %1633 = vadd.xlane.f32.xlu1 %v1632_v48  ;;  %v2141_v55 = vmul.f32 %v5188_v41, %v4531_v12  ;;  %v5191_v41 = vld [vmem:[#allocation38_spill] sm:$0xff] }
 0x4ee   :  { %v2181_v37 = vsel %vm826_vm7, %v2141_v55, 0.0  ;;  %vm2326_vm7 = vcmask 39936  }
 0x4f0   :  { %1455 = vadd.xlane.f32.xlu0 %v1454_v10  ;;  %2173 = vadd.xlane.f32.xlu1 %v2172_v4 }
 0x4f4   :  { %1636 = vadd.xlane.f32.xlu0 %v1635_v25  ;;  %1464 = vadd.xlane.f32.xlu1 %v1463_v22  ;;  %v5189_v25 = vld [vmem:[#allocation36_spill] sm:$0xff] }
 0x4f8   :  { %1814 = vadd.xlane.f32.xlu0 %v1813_v3  ;;  %1645 = vadd.xlane.f32.xlu1 %v1644_v34 }
 0x4fc   :  { %1817 = vadd.xlane.f32.xlu0 %v1816_v29  ;;  %2010 = vadd.xlane.f32.xlu1 %v2009_v40 }
 0x500   :  { %1995 = vadd.xlane.f32.xlu0 %v1994_v30  ;;  %1826 = vadd.xlane.f32.xlu1 %v1825_v46 }
 0x504   :  { %1461 = vadd.xlane.f32.xlu0 %v1460_v18  ;;  %2191 = vadd.xlane.f32.xlu1 %v2190_v23 }
 0x508   :  { %1998 = vadd.xlane.f32.xlu0 %v1997_v1  ;;  %1642 = vadd.xlane.f32.xlu1 %v1641_v61 }
 0x509   :  { %v1423_v58 = vpop.xlane.xlu0 %1422 }
 0x50c   :  { %2176 = vadd.xlane.f32.xlu0 %v2175_v63  ;;  %2007 = vadd.xlane.f32.xlu1 %v2006_v39 }
 0x50d   :  { %v1426_v2 = vpop.xlane.xlu0 %1425 }
 0x50e   :  { %v1604_v6 = vpop.xlane.xlu1 %1603 }
 0x50f   :  { %v2194_v48 = vsel %vm2193_vm12, %v1423_v58, %v1604_v6 }
 0x510   :  { %1639 = vadd.xlane.f32.xlu0 %v1638_v8  ;;  %1458 = vadd.xlane.f32.xlu1 %v1457_v54 }
 0x511   :  { %v1607_v53 = vpop.xlane.xlu0 %1606 }
 0x512   :  { %v2195_v14 = vsel %vm2193_vm12, %v1426_v2, %v1607_v53 }
 0x513   :  { %v1785_v44 = vpop.xlane.xlu1 %1784 }
 0x514   :  { %2179 = vadd.xlane.f32.xlu0 %v2178_v38  ;;  %1823 = vadd.xlane.f32.xlu1 %v1822_v0  ;;  %v2211_v33 = vsel %vm2210_vm13, %v2194_v48, %v1785_v44  ;;  %v5192_v44 = vld [vmem:[#allocation37_spill] sm:$0xff] }
 0x515   :  { %v1788_v32 = vpop.xlane.xlu0 %1787 }
 0x516   :  { %v2212_v12 = vsel %vm2210_vm13, %v2195_v14, %v1788_v32 }
 0x518   :  { %1820 = vadd.xlane.f32.xlu0 %v1819_v35  ;;  %2188 = vadd.xlane.f32.xlu1 %v2187_v27  ;;  %v1966_v15 = vpop.xlane.xlu1 %1965 }
 0x519   :  { %v1969_v11 = vpop.xlane.xlu0 %1968  ;;  %v2228_v10 = vsel %vm2227_vm14, %v2211_v33, %v1966_v15 }
 0x51a   :  { %v2229_v3 = vsel %vm2227_vm14, %v2212_v12, %v1969_v11 }
 0x51c   :  { %2001 = vadd.xlane.f32.xlu0 %v2000_v43  ;;  %2004 = vadd.xlane.f32.xlu1 %v2003_v21 }
 0x51d   :  { %v2147_v4 = vpop.xlane.xlu1 %2146  ;;  %v1429_v60 = vpop.xlane.xlu0 %1428 }
 0x51e   :  { %v2245_v13 = vsel %vm2244_vm15, %v2228_v10, %v2147_v4  ;;  %v5193_v10 = vld [vmem:[#allocation40_spill] sm:$0xff] }
 0x51f   :  { %v2261_v22 = vsub.f32 %v5189_v25, %v2245_v13 }
 0x520   :  { %2182 = vadd.xlane.f32.xlu0 %v2181_v37  ;;  %2185 = vadd.xlane.f32.xlu1 %v2184_v7 }
 0x521   :  { %v2277_v34 = vmin.f32 %v2261_v22, 0.0  ;;  %v1610_v28 = vpop.xlane.xlu1 %1609  ;;  %v2150_v45 = vpop.xlane.xlu0 %2149 }
 0x522   :  { %v2246_v29 = vsel %vm2244_vm15, %v2229_v3, %v2150_v45  ;;  %v2196_v56 = vsel %vm2193_vm12, %v1429_v60, %v1610_v28  ;;  %v5194_v3 = vld [vmem:[#allocation39_spill] sm:$0xff] }
 0x523   :  { %v2293_v40 = vmul.f32 1.442695, %v2277_v34  ;;  %v2262_v36 = vsub.f32 %v5190_v5, %v2246_v29 }
 0x525   :  { %3388 = vpow2.f32 %v2293_v40  ;;  %v2278_v30 = vmin.f32 %v2262_v36, 0.0  ;;  %v1432_v46 = vpop.xlane.xlu1 %1431  ;;  %v1613_v42 = vpop.xlane.xlu0 %1612 }
 0x526   :  { %v2197_v39 = vsel %vm2193_vm12, %v1432_v46, %v1613_v42 }
 0x527   :  { %v2295_v16 = vmul.f32 1.442695, %v2278_v30 }
 0x529   :  { %3390 = vpow2.f32 %v2295_v16  ;;  %v1791_v62 = vpop.xlane.xlu1 %1790  ;;  %v1794_v18 = vpop.xlane.xlu0 %1793 }
 0x52a   :  { %v2213_v1 = vsel %vm2210_vm13, %v2196_v56, %v1791_v62  ;;  %v2214_v9 = vsel %vm2210_vm13, %v2197_v39, %v1794_v18 }
 0x52d   :  { %v1972_v23 = vpop.xlane.xlu1 %1971  ;;  %v1975_v50 = vpop.xlane.xlu0 %1974 }
 0x52e   :  { %v2230_v61 = vsel %vm2227_vm14, %v2213_v1, %v1972_v23  ;;  %v2231_v2 = vsel %vm2227_vm14, %v2214_v9, %v1975_v50 }
 0x531   :  { %v2153_v52 = vpop.xlane.xlu1 %2152  ;;  %v1435_v20 = vpop.xlane.xlu0 %1434 }
 0x532   :  { %v4772_v58 = vpop.eup %3388  ;;  %v2247_v63 = vsel %vm2244_vm15, %v2230_v61, %v2153_v52  ;;  %v5195_v61 = vld [vmem:[#allocation42_spill] sm:$0xff] }
 0x533   :  { %v2263_v17 = vsub.f32 %v5191_v41, %v2247_v63  ;;  %3194 = vmatprep.mubr.msk.f32.mxu1 %vm2326_vm7, %v4772_v58 }
 0x535   :  { %v2279_v6 = vmin.f32 %v2263_v17, 0.0  ;;  %v1616_v8 = vpop.xlane.xlu1 %1615  ;;  %v2156_v54 = vpop.xlane.xlu0 %2155 }
 0x536   :  { %v4781_v57 = vpop.eup %3390  ;;  %v2248_v19 = vsel %vm2244_vm15, %v2231_v2, %v2156_v54  ;;  %v2198_v15 = vsel %vm2193_vm12, %v1435_v20, %v1616_v8  ;;  %v5196_v8 = vld [vmem:[#allocation41_spill] sm:$0xff] }
 0x537   :  { %v2297_v53 = vmul.f32 1.442695, %v2279_v6  ;;  %v2264_v38 = vsub.f32 %v5192_v44, %v2248_v19  ;;  %3195 = vmatmul.mubr.msk.f32.vlgmr.msra.gmra.mxu1 %vm2326_vm7, %v4781_v57 }
 0x539   :  { %3392 = vpow2.f32 %v2297_v53  ;;  %v2280_v0 = vmin.f32 %v2264_v38, 0.0  ;;  %v1438_v24 = vpop.xlane.xlu1 %1437  ;;  %v1619_v26 = vpop.xlane.xlu0 %1618 }
 0x53a   :  { %v2199_v33 = vsel %vm2193_vm12, %v1438_v24, %v1619_v26 }
 0x53b   :  { %v2299_v32 = vmul.f32 1.442695, %v2280_v0 }
 0x53d   :  { %3394 = vpow2.f32 %v2299_v32  ;;  %v1797_v35 = vpop.xlane.xlu1 %1796  ;;  %v1800_v27 = vpop.xlane.xlu0 %1799 }
 0x53e   :  { %v2215_v11 = vsel %vm2210_vm13, %v2198_v15, %v1797_v35  ;;  %v2216_v60 = vsel %vm2210_vm13, %v2199_v33, %v1800_v27  ;;  %v5197_v33 = vld [vmem:[#allocation44_spill] sm:$0xff] }
 0x541   :  { %v1978_v59 = vpop.xlane.xlu1 %1977  ;;  %v1981_v31 = vpop.xlane.xlu0 %1980 }
 0x542   :  { %v2232_v55 = vsel %vm2227_vm14, %v2215_v11, %v1978_v59  ;;  %v2233_v13 = vsel %vm2227_vm14, %v2216_v60, %v1981_v31 }
 0x545   :  { %v2159_v48 = vpop.xlane.xlu1 %2158  ;;  %v1441_v43 = vpop.xlane.xlu0 %1440 }
 0x546   :  { %v4790_v21 = vpop.eup %3392  ;;  %v2249_v47 = vsel %vm2244_vm15, %v2232_v55, %v2159_v48 }
 0x547   :  { %v2265_v4 = vsub.f32 %v5193_v10, %v2249_v47  ;;  %3197 = vmatprep.mubr.msk.f32.mxu1 %vm2326_vm7, %v4790_v21 }
 0x549   :  { %v2281_v14 = vmin.f32 %v2265_v4, 0.0  ;;  %v1622_v25 = vpop.xlane.xlu1 %1621  ;;  %v2162_v22 = vpop.xlane.xlu0 %2161 }
 0x54a   :  { %v4799_v37 = vpop.eup %3394  ;;  %v2250_v7 = vsel %vm2244_vm15, %v2233_v13, %v2162_v22  ;;  %v2200_v42 = vsel %vm2193_vm12, %v1441_v43, %v1622_v25 }
 0x54b   :  { %v2301_v12 = vmul.f32 1.442695, %v2281_v14  ;;  %v2266_v34 = vsub.f32 %v5194_v3, %v2250_v7  ;;  %3198 = vmatmul.mubr.msk.f32.gmra.mxu1 %vm2326_vm7, %v4799_v37 }
 0x54d   :  { %3396 = vpow2.f32 %v2301_v12  ;;  %v2282_v28 = vmin.f32 %v2266_v34, 0.0  ;;  %v1444_v45 = vpop.xlane.xlu1 %1443  ;;  %v1625_v29 = vpop.xlane.xlu0 %1624 }
 0x54e   :  { %v2201_v1 = vsel %vm2193_vm12, %v1444_v45, %v1625_v29 }
 0x54f   :  { %v2303_v40 = vmul.f32 1.442695, %v2282_v28  ;;  %v5198_v28 = vld [vmem:[#allocation43_spill] sm:$0xff] }
 0x551   :  { %3398 = vpow2.f32 %v2303_v40  ;;  %v1803_v5 = vpop.xlane.xlu1 %1802  ;;  %v1806_v36 = vpop.xlane.xlu0 %1805 }
 0x552   :  { %v2217_v16 = vsel %vm2210_vm13, %v2200_v42, %v1803_v5  ;;  %v2218_v20 = vsel %vm2210_vm13, %v2201_v1, %v1806_v36 }
 0x555   :  { %v1984_v30 = vpop.xlane.xlu1 %1983  ;;  %v1987_v46 = vpop.xlane.xlu0 %1986 }
 0x556   :  { %v2234_v62 = vsel %vm2227_vm14, %v2217_v16, %v1984_v30  ;;  %v2235_v63 = vsel %vm2227_vm14, %v2218_v20, %v1987_v46 }
 0x559   :  { %v2165_v18 = vpop.xlane.xlu1 %2164  ;;  %v1447_v23 = vpop.xlane.xlu0 %1446 }
 0x55a   :  { %v4808_v50 = vpop.eup %3396  ;;  %v2251_v56 = vsel %vm2244_vm15, %v2234_v62, %v2165_v18 }
 0x55b   :  { %v2267_v52 = vsub.f32 %v5195_v61, %v2251_v56  ;;  %3200 = vmatprep.mubr.msk.f32.mxu1 %vm2326_vm7, %v4808_v50 }
 0x55d   :  { %v2283_v39 = vmin.f32 %v2267_v52, 0.0  ;;  %v1628_v41 = vpop.xlane.xlu1 %1627  ;;  %v2168_v17 = vpop.xlane.xlu0 %2167 }
 0x55e   :  { %v4817_v9 = vpop.eup %3398  ;;  %v2252_v2 = vsel %vm2244_vm15, %v2235_v63, %v2168_v17  ;;  %v2202_v31 = vsel %vm2193_vm12, %v1447_v23, %v1628_v41  ;;  %v5199_v41 = vld [vmem:[#allocation49_spill] sm:$0xff] }
 0x55f   :  { %v2305_v6 = vmul.f32 1.442695, %v2283_v39  ;;  %v2268_v54 = vsub.f32 %v5196_v8, %v2252_v2  ;;  %3201 = vmatmul.mubr.msk.f32.gmra.mxu1 %vm2326_vm7, %v4817_v9 }
 0x561   :  { %3400 = vpow2.f32 %v2305_v6  ;;  %v2284_v19 = vmin.f32 %v2268_v54, 0.0  ;;  %v1450_v53 = vpop.xlane.xlu1 %1449  ;;  %v1631_v44 = vpop.xlane.xlu0 %1630 }
 0x562   :  { %v2203_v14 = vsel %vm2193_vm12, %v1450_v53, %v1631_v44 }
 0x563   :  { %v2307_v38 = vmul.f32 1.442695, %v2284_v19 }
 0x565   :  { %3402 = vpow2.f32 %v2307_v38  ;;  %v1809_v0 = vpop.xlane.xlu1 %1808  ;;  %v1812_v24 = vpop.xlane.xlu0 %1811 }
 0x566   :  { %v2219_v15 = vsel %vm2210_vm13, %v2202_v31, %v1809_v0  ;;  %v2220_v22 = vsel %vm2210_vm13, %v2203_v14, %v1812_v24 }
 0x569   :  { %v1990_v26 = vpop.xlane.xlu1 %1989  ;;  %v1468_v32 = vpop.xlane.xlu0 %1467 }
 0x56a   :  { %v2236_v11 = vsel %vm2227_vm14, %v2219_v15, %v1990_v26  ;;  %v5200_v26 = vld [vmem:[#allocation46_spill] sm:$0xff] }
 0x56d   :  { %v1649_v35 = vpop.xlane.xlu1 %1648  ;;  %v1993_v27 = vpop.xlane.xlu0 %1992 }
 0x56e   :  { %v4823_v59 = vpop.eup %3400  ;;  %v2237_v7 = vsel %vm2227_vm14, %v2220_v22, %v1993_v27  ;;  %v2209_v56 = vsel %vm2193_vm12, %v1468_v32, %v1649_v35 }
 0x56f   :  { %3203 = vmatprep.mubr.msk.f32.mxu1 %vm2326_vm7, %v4823_v59 }
 0x571   :  { %v2171_v55 = vpop.xlane.xlu1 %2170  ;;  %v1453_v48 = vpop.xlane.xlu0 %1452 }
 0x572   :  { %v4830_v43 = vpop.eup %3402  ;;  %v2253_v47 = vsel %vm2244_vm15, %v2236_v11, %v2171_v55 }
 0x573   :  { %v2269_v10 = vsub.f32 %v5197_v33, %v2253_v47  ;;  %3204 = vmatmul.mubr.msk.f32.gmra.mxu1 %vm2326_vm7, %v4830_v43 }
 0x575   :  { %v2285_v4 = vmin.f32 %v2269_v10, 0.0  ;;  %v1634_v60 = vpop.xlane.xlu1 %1633  ;;  %v1830_v13 = vpop.xlane.xlu0 %1829 }
 0x576   :  { %v2226_v1 = vsel %vm2210_vm13, %v2209_v56, %v1830_v13  ;;  %v2204_v54 = vsel %vm2193_vm12, %v1453_v48, %v1634_v60  ;;  %v5201_v60 = vld [vmem:[#allocation45_spill] sm:$0xff] }
 0x577   :  { %v2309_v25 = vmul.f32 1.442695, %v2285_v4 }
 0x579   :  { %3404 = vpow2.f32 %v2309_v25  ;;  %v2174_v12 = vpop.xlane.xlu1 %2173  ;;  %v1456_v3 = vpop.xlane.xlu0 %1455 }
 0x57a   :  { %v2254_v34 = vsel %vm2244_vm15, %v2237_v7, %v2174_v12 }
 0x57b   :  { %v2270_v45 = vsub.f32 %v5198_v28, %v2254_v34 }
 0x57d   :  { %v2286_v29 = vmin.f32 %v2270_v45, 0.0  ;;  %v1465_v40 = vpop.xlane.xlu1 %1464  ;;  %v1637_v5 = vpop.xlane.xlu0 %1636  ;;  %v5202_v45 = vld [vmem:[#allocation50_spill] sm:$0xff] }
 0x57e   :  { %v2205_v15 = vsel %vm2193_vm12, %v1456_v3, %v1637_v5 }
 0x57f   :  { %v2311_v36 = vmul.f32 1.442695, %v2286_v29 }
 0x581   :  { %3406 = vpow2.f32 %v2311_v36  ;;  %v1646_v30 = vpop.xlane.xlu1 %1645  ;;  %v1815_v46 = vpop.xlane.xlu0 %1814 }
 0x582   :  { %v2221_v53 = vsel %vm2210_vm13, %v2204_v54, %v1815_v46  ;;  %v2208_v4 = vsel %vm2193_vm12, %v1465_v40, %v1646_v30 }
 0x585   :  { %v2011_v42 = vpop.xlane.xlu1 %2010  ;;  %v1818_v16 = vpop.xlane.xlu0 %1817 }
 0x586   :  { %v4841_v62 = vpop.eup %3404  ;;  %v2243_v61 = vsel %vm2227_vm14, %v2226_v1, %v2011_v42  ;;  %v2222_v55 = vsel %vm2210_vm13, %v2205_v15, %v1818_v16 }
 0x587   :  { %3206 = vmatprep.mubr.msk.f32.mxu1 %vm2326_vm7, %v4841_v62 }
 0x589   :  { %v1827_v18 = vpop.xlane.xlu1 %1826  ;;  %v1996_v23 = vpop.xlane.xlu0 %1995 }
 0x58a   :  { %v2238_v44 = vsel %vm2227_vm14, %v2221_v53, %v1996_v23  ;;  %v2225_v14 = vsel %vm2210_vm13, %v2208_v4, %v1827_v18  ;;  %v5207_v4 = vld [vmem:[#allocation34_spill] sm:$0xff] }
 0x58d   :  { %v2192_v52 = vpop.xlane.xlu1 %2191  ;;  %v1462_v20 = vpop.xlane.xlu0 %1461 }
 0x58e   :  { %v4848_v63 = vpop.eup %3406  ;;  %v2260_v39 = vsel %vm2244_vm15, %v2243_v61, %v2192_v52 }
 0x58f   :  { %v2276_v17 = vsub.f32 %v5199_v41, %v2260_v39  ;;  %3207 = vmatmul.mubr.msk.f32.gmra.mxu1 %vm2326_vm7, %v4848_v63 }
 0x591   :  { %v2292_v2 = vmin.f32 %v2276_v17, 0.0  ;;  %v1643_v6 = vpop.xlane.xlu1 %1642  ;;  %v1999_v8 = vpop.xlane.xlu0 %1998 }
 0x592   :  { %v2239_v48 = vsel %vm2227_vm14, %v2222_v55, %v1999_v8  ;;  %v2207_v30 = vsel %vm2193_vm12, %v1462_v20, %v1643_v6  ;;  %v5203_v20 = vld [vmem:[#allocation47_spill] sm:$0xff] }
 0x593   :  { %v2323_v19 = vmul.f32 1.442695, %v2292_v2  ;;  %v5204_v2 = vld [vmem:[#allocation48_spill] sm:$0xff] }
 0x595   :  { %3408 = vpow2.f32 %v2323_v19  ;;  %v2008_v38 = vpop.xlane.xlu1 %2007  ;;  %v2177_v0 = vpop.xlane.xlu0 %2176 }
 0x596   :  { %v2255_v24 = vsel %vm2244_vm15, %v2238_v44, %v2177_v0  ;;  %v2242_v25 = vsel %vm2227_vm14, %v2225_v14, %v2008_v38 }
 0x597   :  { %v2271_v32 = vsub.f32 %v5200_v26, %v2255_v24 }
 0x599   :  { %v2287_v35 = vmin.f32 %v2271_v32, 0.0  ;;  %v1459_v27 = vpop.xlane.xlu1 %1458  ;;  %v1640_v31 = vpop.xlane.xlu0 %1639 }
 0x59a   :  { %v2206_v46 = vsel %vm2193_vm12, %v1459_v27, %v1640_v31 }
 0x59b   :  { %v2313_v11 = vmul.f32 1.442695, %v2287_v35 }
 0x59d   :  { %3410 = vpow2.f32 %v2313_v11  ;;  %v1824_v47 = vpop.xlane.xlu1 %1823  ;;  %v2180_v33 = vpop.xlane.xlu0 %2179 }
 0x59e   :  { %v2256_v10 = vsel %vm2244_vm15, %v2239_v48, %v2180_v33  ;;  %v2224_v16 = vsel %vm2210_vm13, %v2207_v30, %v1824_v47  ;;  %v5206_v47 = vld [vmem:[#allocation33_spill] sm:$0xff]  ;;  %v5215_v30 = vld [vmem:[#allocation26_spill] sm:$0xff] }
 0x59f   :  { %v2272_v13 = vsub.f32 %v5201_v60, %v2256_v10 }
 0x5a1   :  { %v2288_v22 = vmin.f32 %v2272_v13, 0.0  ;;  %v2189_v7 = vpop.xlane.xlu1 %2188  ;;  %v1821_v12 = vpop.xlane.xlu0 %1820  ;;  %v5208_v13 = vld [vmem:[#allocation31_spill] sm:$0xff] }
 0x5a2   :  { %v3409_v3 = vpop.eup %3408  ;;  %v2259_v34 = vsel %vm2244_vm15, %v2242_v25, %v2189_v7  ;;  %v2223_v18 = vsel %vm2210_vm13, %v2206_v46, %v1821_v12  ;;  %v5209_v25 = vld [vmem:[#allocation32_spill] sm:$0xff]  ;;  %v5210_v7 = vld [vmem:[#allocation29_spill] sm:$0xff] }
 0x5a3   :  { %v2315_v28 = vmul.f32 1.442695, %v2288_v22  ;;  %v2275_v29 = vsub.f32 %v5202_v45, %v2259_v34  ;;  %3254 = vmatpush3.msra.mxu1 %v3409_v3 }
 0x5a4   :  { %3255 = vmatprep.subr.mxu1 %v5179_v49 }
 0x5a5   :  { %3412 = vpow2.f32 %v2315_v28  ;;  %v2291_v40 = vmin.f32 %v2275_v29, 0.0  ;;  %v2005_v5 = vpop.xlane.xlu1 %2004  ;;  %v2002_v36 = vpop.xlane.xlu0 %2001  ;;  %v5212_v28 = vld [vmem:[#allocation27_spill] sm:$0xff]  ;;  %v5213_v29 = vld [vmem:[#allocation28_spill] sm:$0xff] }
 0x5a6   :  { %v2241_v23 = vsel %vm2227_vm14, %v2224_v16, %v2005_v5  ;;  %v2240_v56 = vsel %vm2227_vm14, %v2223_v18, %v2002_v36  ;;  %v5214_v5 = vld [vmem:[#allocation25_spill] sm:$0xff] }
 0x5a7   :  { %v2321_v42 = vmul.f32 1.442695, %v2291_v40 }
 0x5a9   :  { %3414 = vpow2.f32 %v2321_v42  ;;  %v2186_v1 = vpop.xlane.xlu1 %2185  ;;  %v2183_v61 = vpop.xlane.xlu0 %2182  ;;  %v5216_v42 = vld [vmem:[#allocation23_spill] sm:$0xff] }
 0x5aa   :  { %v3411_v52 = vpop.eup %3410  ;;  %v2258_v39 = vsel %vm2244_vm15, %v2241_v23, %v2186_v1  ;;  %v2257_v41 = vsel %vm2244_vm15, %v2240_v56, %v2183_v61  ;;  %v5217_v23 = vld [vmem:[#allocation24_spill] sm:$0xff] }
 0x5ab   :  { %v2274_v17 = vsub.f32 %v5203_v20, %v2258_v39  ;;  %v2273_v6 = vsub.f32 %v5204_v2, %v2257_v41  ;;  %3209 = vmatprep.mubr.msk.f32.mxu1 %vm2326_vm7, %v3411_v52  ;;  %v5219_v41 = vld [vmem:[#allocation22_spill] sm:$0xff] }
 0x5ad   :  { %v2290_v8 = vmin.f32 %v2274_v17, 0.0  ;;  %v2289_v54 = vmin.f32 %v2273_v6, 0.0  ;;  %v5220_v17 = vld [vmem:[#allocation19_spill] sm:$0xff]  ;;  %v5221_v6 = vld [vmem:[#allocation20_spill] sm:$0xff] }
 0x5af   :  { %v2319_v19 = vmul.f32 1.442695, %v2290_v8  ;;  %v2317_v53 = vmul.f32 1.442695, %v2289_v54 }
 0x5b1   :  { %3416 = vpow2.f32 %v2319_v19 }
 0x5b2   :  { %v3413_v44 = vpop.eup %3412  ;;  %3418 = vpow2.f32 %v2317_v53 }
 0x5b3   :  { %3210 = vmatmul.mubr.msk.f32.gmra.mxu1 %vm2326_vm7, %v3413_v44 }
 0x5b6   :  { %v3415_v38 = vpop.eup %3414 }
 0x5b7   :  { %3256 = vmatpush3.msra.mxu1 %v3415_v38 }
 0x5b8   :  { %3257 = vmatprep.subr.mxu1 %v5179_v49 }
 0x5be   :  { %v3417_v0 = vpop.eup %3416 }
 0x5bf   :  { %v3419_v24 = vpop.eup %3418  ;;  %3258 = vmatpush3.msra.mxu1 %v3417_v0 }
 0x5c0   :  { %3212 = vmatprep.mubr.msk.f32.mxu1 %vm2326_vm7, %v3419_v24  ;;  %3259 = vmatprep.subr.mxu1 %v5179_v49 }
 0x5c1   :  { %3213 = vmatmul.mubr.msk.f32.gmra.mxu1 %vm2326_vm7, %v3417_v0 }
 0x5c2   :  { %3215 = vmatprep.mubr.msk.f32.mxu1 %vm2326_vm7, %v3415_v38  ;;  %3260 = vmatpush3.msra.mxu1 %v3419_v24  ;;  %v2904_v38 = vld [vmem:[%s4990_s14] ss:$0 sm:$0xff] }
 0x5c3   :  { %3261 = vmatprep.subr.mxu1 %v5179_v49 }
 0x5c4   :  { %3262 = vmatpush3.msra.mxu1 %v3413_v44 }
 0x5c5   :  { %3216 = vmatmul.mubr.msk.f32.gmra.mxu1 %vm2326_vm7, %v3409_v3  ;;  %3263 = vmatprep.subr.mxu1 %v5179_v49  ;;  %v5211_v3 = vld [vmem:[#allocation30_spill] sm:$0xff] }
 0x5c6   :  { %3264 = vmatpush3.msra.mxu1 %v3411_v52  ;;  %3285 = vmatprep.mubr.msk.f32.mxu1 %vm3423_vm1, %v5179_v49  ;;  %v5218_v52 = vld [vmem:[#allocation21_spill] sm:$0xff] }
 0x5c7   :  { %3265 = vmatprep.subr.mxu1 %v5179_v49 }
 0x5c8   :  { %3266 = vmatpush3.msra.mxu1 %v4848_v63 }
 0x5c9   :  { %3267 = vmatprep.subr.mxu1 %v5179_v49 }
 0x5ca   :  { %3268 = vmatpush3.msra.mxu1 %v4841_v62  ;;  %v5205_v62 = vlaneseq }
 0x5cb   :  { %3269 = vmatprep.subr.mxu1 %v5179_v49 }
 0x5cc   :  { %3270 = vmatpush3.msra.mxu1 %v4830_v43  ;;  %v4907_v63 = vshrl.u32 %v5205_v62, 7 }
 0x5cd   :  { %3271 = vmatprep.subr.mxu1 %v5179_v49 }
 0x5ce   :  { %3272 = vmatpush3.msra.mxu1 %v4823_v59  ;;  %v4913_v59 = vld [vmem:[%s4989_s0] ss:$0 sm:$0xff] }
 0x5cf   :  { %3273 = vmatprep.subr.mxu1 %v5179_v49  ;;  %vm692_vm0 = vcmp.eq.s32.totalorder %v4907_v63, %v4913_v59  ;;  %v5222_v59 = vld [vmem:[#allocation2_spill] sm:$0xff] }
 0x5d0   :  { %3274 = vmatpush3.msra.mxu1 %v4817_v9 }
 0x5d1   :  { %3275 = vmatprep.subr.mxu1 %v5179_v49 }
 0x5d2   :  { %3276 = vmatpush3.msra.mxu1 %v4808_v50 }
 0x5d3   :  { %3277 = vmatprep.subr.mxu1 %v5179_v49 }
 0x5d4   :  { %3278 = vmatpush3.msra.mxu1 %v4799_v37  ;;  %v3429_v37 = vmov 1.0  }
 0x5d5   :  { %3279 = vmatprep.subr.mxu1 %v5179_v49 }
 0x5d6   :  { %3280 = vmatpush3.msra.mxu1 %v4790_v21 }
 0x5d7   :  { %3281 = vmatprep.subr.mxu1 %v5179_v49 }
 0x5d8   :  { %3282 = vmatpush3.msra.mxu1 %v4781_v57 }
 0x5d9   :  { %3283 = vmatprep.subr.mxu1 %v5179_v49 }
 0x5da   :  { %3284 = vmatpush3.msra.mxu1 %v4772_v58 }
 0x5db   :  { %3286 = vmatmul.mubr.msk.f32.vlgmr.msra.gmra.mxu1 %vm692_vm0, %v3429_v37 }
 0x5f7   :  { %v3196_v50 = vpop.f32.mrf.mxu1 }
 0x5f8   :  { %v2525_v2 = vmul.f32 %v3196_v50, %v5220_v17 }
 0x5f9   :  { %v2445_v9 = vpop.f32.mrf.mxu1 }
 0x5fa   :  { %v2524_v8 = vmul.f32 %v2445_v9, %v5221_v6 }
 0x60b   :  { %v3199_v21 = vpop.f32.mrf.mxu1 }
 0x60c   :  { %v2527_v39 = vmul.f32 %v3199_v21, %v5218_v52 }
 0x60d   :  { %v2455_v43 = vpop.f32.mrf.mxu1 }
 0x60e   :  { %v2526_v20 = vmul.f32 %v2455_v43, %v5219_v41 }
 0x61f   :  { %v3202_v26 = vpop.f32.mrf.mxu1 }
 0x620   :  { %v2529_v16 = vmul.f32 %v3202_v26, %v5216_v42 }
 0x621   :  { %v2465_v32 = vpop.f32.mrf.mxu1 }
 0x622   :  { %v2528_v56 = vmul.f32 %v2465_v32, %v5217_v23 }
 0x633   :  { %v3205_v57 = vpop.f32.mrf.mxu1 }
 0x634   :  { %v2531_v36 = vmul.f32 %v3205_v57, %v5214_v5 }
 0x635   :  { %v2475_v35 = vpop.f32.mrf.mxu1 }
 0x636   :  { %v2530_v46 = vmul.f32 %v2475_v35, %v5215_v30 }
 0x64f   :  { %v3208_v27 = vpop.f32.mrf.mxu1 }
 0x650   :  { %v2533_v45 = vmul.f32 %v3208_v27, %v5212_v28 }
 0x651   :  { %v2485_v31 = vpop.f32.mrf.mxu1 }
 0x652   :  { %v2532_v40 = vmul.f32 %v2485_v31, %v5213_v29 }
 0x673   :  { %v3211_v15 = vpop.f32.mrf.mxu1 }
 0x674   :  { %v2535_v12 = vmul.f32 %v3211_v15, %v5210_v7 }
 0x675   :  { %v2495_v11 = vpop.f32.mrf.mxu1 }
 0x676   :  { %v2534_v34 = vmul.f32 %v2495_v11, %v5211_v3 }
 0x681   :  { %v3214_v55 = vpop.f32.mrf.mxu1 }
 0x682   :  { %v2537_v14 = vmul.f32 %v3214_v55, %v5208_v13 }
 0x683   :  { %v2505_v58 = vpop.f32.mrf.mxu1 }
 0x684   :  { %v2536_v22 = vmul.f32 %v2505_v58, %v5209_v25 }
 0x685   :  { %v3217_v48 = vpop.f32.mrf.mxu1 }
 0x686   :  { %v2539_v33 = vmul.f32 %v3217_v48, %v5206_v47 }
 0x687   :  { %v2515_v10 = vpop.f32.mrf.mxu1 }
 0x688   :  { %v2538_v60 = vmul.f32 %v2515_v10, %v5207_v4  ;;  %3219 = vmatpush3.msra.mxu0 %v2539_v33 }
 0x689   :  { %3220 = vmatprep.subr.mxu0 %v5179_v49 }
 0x68a   :  { %3221 = vmatpush3.msra.mxu0 %v2538_v60 }
 0x68b   :  { %3222 = vmatprep.subr.mxu0 %v5179_v49 }
 0x68c   :  { %3223 = vmatpush3.msra.mxu0 %v2537_v14 }
 0x68d   :  { %3224 = vmatprep.subr.mxu0 %v5179_v49 }
 0x68e   :  { %3225 = vmatpush3.msra.mxu0 %v2536_v22 }
 0x68f   :  { %3226 = vmatprep.subr.mxu0 %v5179_v49 }
 0x690   :  { %3227 = vmatpush3.msra.mxu0 %v2535_v12 }
 0x691   :  { %3228 = vmatprep.subr.mxu0 %v5179_v49 }
 0x692   :  { %3229 = vmatpush3.msra.mxu0 %v2534_v34 }
 0x693   :  { %3230 = vmatprep.subr.mxu0 %v5179_v49 }
 0x694   :  { %3231 = vmatpush3.msra.mxu0 %v2533_v45 }
 0x695   :  { %3232 = vmatprep.subr.mxu0 %v5179_v49 }
 0x696   :  { %3233 = vmatpush3.msra.mxu0 %v2532_v40 }
 0x697   :  { %3234 = vmatprep.subr.mxu0 %v5179_v49 }
 0x698   :  { %3235 = vmatpush3.msra.mxu0 %v2531_v36 }
 0x699   :  { %3236 = vmatprep.subr.mxu0 %v5179_v49 }
 0x69a   :  { %3237 = vmatpush3.msra.mxu0 %v2530_v46 }
 0x69b   :  { %3238 = vmatprep.subr.mxu0 %v5179_v49  ;;  %v2676_v18 = vpop.f32.mrf.mxu1 }
 0x69c   :  { %v2677_v1 = vadd.f32 1e-16, %v2676_v18  ;;  %3239 = vmatpush3.msra.mxu0 %v2529_v16 }
 0x69d   :  { %3240 = vmatprep.subr.mxu0 %v5179_v49  ;;  %v3287_v61 = vpop.f32.mrf.mxu1 }
 0x69e   :  { %3420 = vrcp.f32 %v2677_v1  ;;  %3241 = vmatpush3.msra.mxu0 %v2528_v56 }
 0x69f   :  { %3242 = vmatprep.subr.mxu0 %v5179_v49 }
 0x6a0   :  { %3243 = vmatpush3.msra.mxu0 %v2527_v39 }
 0x6a1   :  { %3244 = vmatprep.subr.mxu0 %v5179_v49 }
 0x6a2   :  { %3245 = vmatpush3.msra.mxu0 %v2526_v20 }
 0x6a3   :  { %3246 = vmatprep.subr.mxu0 %v5179_v49 }
 0x6a4   :  { %3247 = vmatpush3.msra.mxu0 %v2525_v2 }
 0x6a5   :  { %3248 = vmatprep.subr.mxu0 %v5179_v49 }
 0x6a6   :  { %3249 = vmatpush3.msra.mxu0 %v2524_v8 }
 0x6a7   :  { %3251 = vmatmul.mubr.msk.f32.vlgmr.msra.gmra.mxu0 %vm692_vm0, %v3429_v37  ;;  %3288 = vmatprep.subr.mxu0 %v5179_v49 }
 0x6a8   :  { %3289 = vmatpush3.msk.msra.mxu0 %vm2375_vm11, %v4600_v51  ;;  %3290 = vmatprep.mubr.msk.f32.mxu0 %vm3423_vm1, %v5179_v49  ;;  %v5223_v49 = vmax.f32 %v5222_v59, 0.0 }
 0x6ab   :  { %v3421_v54 = vpop.eup %3420 }
 0x6ac   :  { %3291 = vmatmul.mubr.msk.f32.vlgmr.msra.gmra.mxu0 %vm2326_vm7, %v3421_v54 }
 0x767   :  { %v2606_v19 = vpop.f32.mrf.mxu0 }
 0x769   :  { %v3252_v53 = vpop.f32.mrf.mxu0 }
 0x76c   :  { %v2751_v44 = vpop.f32.mrf.mxu0 }
 0x76d   :  { %v2755_v0 = vmul.f32 %v2751_v44, %v2606_v19 }
 0x76e   :  { %v3292_v24 = vpop.f32.mrf.mxu0 }
 0x76f   :  { %v2763_v62 = vadd.f32 %v2904_v38, %v2755_v0 }
 0x771   :  { %v2764_v63 = vmax.f32 %v2763_v62, 0.0 }
 0x773   :  { %2766 = vrot.lane.b32.xlu1 %v2764_v63, %s3430_s5 }
 0x7e5   :  { %v2767_v51 = vpop.permute.xlu1 %2766 }
 0x7e6   :  { %v2769_v37 = vsel %vm408_vm5, %v5223_v49, %v2767_v51 }
 0x7e7   :  { %v2771_v50 = vsel %vm2770_vm2, %v2769_v37, 0.0 }
 0x7e8   :  { %2772 = vst [vmem:[%s4991_s15] sm:$0xff] %v2771_v50 }

</bundles_post_ra>
